<compile_context>
chip_gen: v5e
topology: v5e:2x2
jax: 0.10.0
libtpu: 0.0.40
codegen_flags: <defaults>
</compile_context>

<pallas_src>
import jax
import jax.numpy as jnp
import numpy as np
from jax import lax
from jax.experimental import pallas as pl
from jax.experimental.pallas import tpu as pltpu

D_MODEL = 32
KERNEL = 7
C = 4                    # number of (shared-weight) repeats
PAD = KERNEL // 2
EPS = 1e-5               # nn.LayerNorm default

# MXU operand dtype.  bf16 is full-rate on the MXU and halves the VMEM traffic
# of the materialized (K*D, S) slab; accumulation is f32.  Requires a looser
# test tolerance (~1e-2) than a pure-f32 matmul.
MATMUL_DTYPE = jnp.bfloat16


def encoder_layer_kernel(x_ref, w_ref, b_ref, g_ref, beta_ref, o_ref, xp_ref):
    # x_ref:    (BBLK, D, S)           batch tile, channels on sublanes
    # w_ref:    (D, K*D)               packed conv weight, MATMUL_DTYPE
    # b_ref:    (D, 1)                 conv bias
    # g_ref:    (D, 1)                 layernorm gamma
    # beta_ref: (D, 1)                 layernorm beta
    # o_ref:    (BBLK, D, S)           lane-dense output (S on lanes)
    # xp_ref:   (BBLK, D, S + 2*PAD)   MATMUL_DTYPE scratch (lane-padded input)
    bblk, d, s_len = x_ref.shape

    # Zero ONLY the pad lanes, once.  The interior is rewritten every repeat,
    # the pad lanes are never touched again, so they stay zero across repeats.
    xp_ref[:, :, :PAD] = jnp.zeros((bblk, d, PAD), xp_ref.dtype)
    xp_ref[:, :, PAD + s_len:PAD + s_len + PAD] = jnp.zeros(
        (bblk, d, PAD), xp_ref.dtype)

    # Hoisted parameter loads / broadcasts (shared across the C repeats;
    # JAX does not CSE broadcast_in_dim, so materialize them once).
    w = w_ref[...]                                                  # (D, K*D)
    bias = jnp.broadcast_to(b_ref[...].astype(jnp.float32), (d, s_len))
    gamma = jnp.broadcast_to(g_ref[...].astype(jnp.float32), (d, s_len))
    beta = jnp.broadcast_to(beta_ref[...].astype(jnp.float32), (d, s_len))

    def repeat_body(_, src):                                # src: (BBLK, D, S) f32
        # Refresh only the interior lanes of the padded buffer (bf16 store).
        xp_ref[:, :, PAD:PAD + s_len] = src.astype(xp_ref.dtype)

        # im2col along the SUBLANE axis: K lane-shifted (D, S) reads stacked
        # into a (K*D, S) slab (sublane concat in multiples of 32 -> no
        # relayout; the lane shifts are cheap XLU work), then ONE MXU push per
        # batch row: contraction dim K*D = 224, N = S.
        ys = []
        for b in range(bblk):
            slab = jnp.concatenate(
                [xp_ref[b, :, k:k + s_len] for k in range(KERNEL)], axis=0)
            ys.append(jnp.dot(w, slab, preferred_element_type=jnp.float32))
        y = jnp.stack(ys, axis=0) + bias                    # (BBLK, D, S) f32

        # TODO(synk): dropout3 is identity at inference time (no RNG applied).
        src = src + jnp.maximum(y, 0.0)                     # ReLU + residual

        # LayerNorm over d_model (the sublane axis); two-pass centered
        # variance (no E[x^2]-E[x]^2 cancellation), rsqrt on the EUP slot.
        mean = jnp.mean(src, axis=1, keepdims=True)
        xc = src - mean
        var = jnp.mean(xc * xc, axis=1, keepdims=True)
        return xc * lax.rsqrt(var + EPS) * gamma + beta

    src0 = x_ref[...].astype(jnp.float32)
    src = lax.fori_loop(0, C, repeat_body, src0, unroll=True)

    # Lane-dense store: last dim is S (unmasked vst when S % 128 == 0).
    o_ref[...] = src.astype(o_ref.dtype)


def _vmem_bytes_per_row(s_len, d, k=KERNEL):
    """Rough per-batch-row VMEM bytes: double-buffered in/out blocks, the padded
    conv scratch, the compiler-materialized (K*D, S) slab, and working temps."""
    mm = jnp.dtype(MATMUL_DTYPE).itemsize
    io = 2 * 2 * s_len * d * 4                 # 2x-buffered input + output block
    xp = (s_len + 2 * PAD) * d * mm            # padded scratch
    slab = k * d * s_len * mm                  # materialized matmul operand
    work = 4 * s_len * d * 4                   # src / y / LayerNorm temporaries
    return io + xp + slab + work


def _num_tensorcores():
    """2 only on v7x (megacore); v5e/v6e have a single TensorCore."""
    try:
        kind = jax.devices()[0].device_kind.lower()
    except Exception:
        return 1
    return 2 if ("v7" in kind or "tpu7" in kind) else 1


def _pick_bblk(batch, per_row_bytes, two_tensorcores,
               budget_bytes=24 << 20, max_bblk=8):
    """Largest batch tile fitting the VMEM budget.  Only insist on >= 2 grid
    steps when the chip has 2 TensorCores (v7x); on single-TC chips (v5e/v6e)
    extra grid steps are pure pipeline overhead (~0.35us each)."""
    best = 1
    for cand in range(1, min(batch, max_bblk) + 1):
        if batch % cand:
            continue
        if cand * per_row_bytes > budget_bytes:
            continue
        if two_tensorcores and batch >= 2 and batch // cand < 2:
            continue
        best = cand
    return best


def transformer_encoder_layer_ex(x, conv_w, conv_b, ln_g, ln_b, bblk=None):
    """x: (B, S, D) float32.  conv_w: (D_out, D_in, K) PyTorch Conv1d layout."""
    B, S, D = x.shape
    K = conv_w.shape[2]

    per_row = _vmem_bytes_per_row(S, D, K)
    if bblk is None:
        bblk = _pick_bblk(B, per_row, _num_tensorcores() >= 2)
    assert B % bblk == 0, (B, bblk)

    # Channels-on-sublane / sequence-on-lane working layout (layout plumbing
    # done in the wrapper).  On v5e, feeding bf16 activations here would also
    # halve the HBM DMA volume; kept f32 so residual/LN inputs are exact.
    x_t = jnp.transpose(x, (0, 2, 1))                        # (B, D, S)

    # (D_out, D_in, K) -> (D_out, K, D_in) -> (D_out, K*D_in): column k*D+d_in
    # matches the sublane order of the stacked im2col slab.
    w_packed = jnp.transpose(conv_w, (0, 2, 1)).reshape(D, K * D)
    w_packed = w_packed.astype(MATMUL_DTYPE)
    b2 = conv_b.reshape(D, 1).astype(jnp.float32)
    g2 = ln_g.reshape(D, 1).astype(jnp.float32)
    be2 = ln_b.reshape(D, 1).astype(jnp.float32)

    # Explicit scoped-VMEM limit: safe on v5e (16 MiB default), v6e/v7x
    # (32 MiB default, 64 MiB physical on v7x).
    vmem_limit = int(min(max(2 * bblk * per_row, 32 << 20), 48 << 20))

    out_t = pl.pallas_call(
        encoder_layer_kernel,
        out_shape=jax.ShapeDtypeStruct((B, D, S), x.dtype),
        grid_spec=pltpu.PrefetchScalarGridSpec(
            num_scalar_prefetch=0,
            grid=(B // bblk,),
            in_specs=[
                pl.BlockSpec((bblk, D, S), lambda b: (b, 0, 0)),
                pl.BlockSpec((D, K * D), lambda b: (0, 0)),
                pl.BlockSpec((D, 1), lambda b: (0, 0)),
                pl.BlockSpec((D, 1), lambda b: (0, 0)),
                pl.BlockSpec((D, 1), lambda b: (0, 0)),
            ],
            out_specs=pl.BlockSpec((bblk, D, S), lambda b: (b, 0, 0)),
            scratch_shapes=[pltpu.VMEM((bblk, D, S + 2 * PAD), MATMUL_DTYPE)],
        ),
        compiler_params=pltpu.CompilerParams(
            dimension_semantics=("parallel",),
            vmem_limit_bytes=vmem_limit),
    )(x_t, w_packed, b2, g2, be2)

    return jnp.transpose(out_t, (0, 2, 1))                   # (B, S, D)


def reference(x, conv_w, conv_b, ln_g, ln_b):
    """Pure-JAX reference mirroring the PyTorch forward (eval mode)."""
    src = x.astype(jnp.float32)
    for _ in range(C):
        xin = jnp.transpose(src, (0, 2, 1))                  # (B, D, S) == NCW
        y = lax.conv_general_dilated(
            xin, conv_w.astype(jnp.float32),
            window_strides=(1,), padding=[(PAD, PAD)],
            dimension_numbers=("NCW", "OIW", "NCW"),
            precision=lax.Precision.HIGHEST)
        y = y + conv_b.reshape(1, -1, 1)
        y = jnp.maximum(y, 0.0)                              # ReLU
        src = src + jnp.transpose(y, (0, 2, 1))              # residual
        mean = jnp.mean(src, axis=-1, keepdims=True)
        var = jnp.mean((src - mean) ** 2, axis=-1, keepdims=True)
        src = (src - mean) / jnp.sqrt(var + EPS) * ln_g + ln_b
    return src


if __name__ == "__main__":
    key = jax.random.PRNGKey(0)
    k_x, k_w, k_b, k_g, k_be = jax.random.split(key, 5)

    B, S, D = 2, 16, D_MODEL
    x = jax.random.normal(k_x, (B, S, D), dtype=jnp.float32)

    # Deterministic parameter init (PyTorch Conv1d default: U(-1/sqrt(fan_in), +)).
    fan_in = D * KERNEL
    bound = 1.0 / np.sqrt(fan_in)
    conv_w = jax.random.uniform(k_w, (D, D, KERNEL), jnp.float32, -bound, bound)
    conv_b = jax.random.uniform(k_b, (D,), jnp.float32, -bound, bound)
    # Non-trivial LayerNorm affine so gamma/beta handling is actually exercised.
    ln_g = 1.0 + 0.1 * jax.random.uniform(k_g, (D,), jnp.float32, -1.0, 1.0)
    ln_b = 0.1 * jax.random.normal(k_be, (D,), dtype=jnp.float32)

    out = transformer_encoder_layer_ex(x, conv_w, conv_b, ln_g, ln_b)
    out = jax.block_until_ready(out)

    ref = reference(x, conv_w, conv_b, ln_g, ln_b)
    # bf16 MXU operands (vs. the f32 HIGHEST-precision reference) need a looser
    # tolerance than the pure-f32 kernel's 1e-3.
    np.testing.assert_allclose(np.asarray(out), np.asarray(ref),
                               rtol=3e-2, atol=3e-2)
    print("KERNEL_OK")
</pallas_src>

<mosaic_0001>
module attributes {stable_mosaic.version = 11 : i64} {
  func.func @encoder_layer_kernel(%arg0: i32, %arg1: memref<2x32x16xf32, #tpu.memory_space<vmem>>, %arg2: memref<32x224xbf16, #tpu.memory_space<vmem>>, %arg3: memref<32x1xf32, #tpu.memory_space<vmem>>, %arg4: memref<32x1xf32, #tpu.memory_space<vmem>>, %arg5: memref<32x1xf32, #tpu.memory_space<vmem>>, %arg6: memref<2x32x16xf32, #tpu.memory_space<vmem>>, %arg7: memref<2x32x22xbf16, #tpu.memory_space<vmem>>) attributes {dimension_semantics = [#tpu.dimension_semantics<parallel>], iteration_bounds = array<i64: 1>, scalar_prefetch = 0 : i64, scratch_operands = 1 : i64, tpu.core_type = #tpu.core_type<tc>, window_params = [{transform_indices = @transform_0, window_bounds = array<i64: 2, 32, 16>}, {pipeline_mode = #tpu.pipeline_mode<synchronous>, transform_indices = @transform_1, window_bounds = array<i64: 32, 224>}, {pipeline_mode = #tpu.pipeline_mode<synchronous>, transform_indices = @transform_2, window_bounds = array<i64: 32, 1>}, {pipeline_mode = #tpu.pipeline_mode<synchronous>, transform_indices = @transform_3, window_bounds = array<i64: 32, 1>}, {pipeline_mode = #tpu.pipeline_mode<synchronous>, transform_indices = @transform_4, window_bounds = array<i64: 32, 1>}, {transform_indices = @transform_5, window_bounds = array<i64: 2, 32, 16>}]} {
    %cst = arith.constant 0.000000e+00 : bf16
    %0 = vector.broadcast %cst : bf16 to vector<2x32x3xbf16>
    %c0 = arith.constant 0 : index
    %c0_0 = arith.constant 0 : index
    %c0_1 = arith.constant 0 : index
    %1 = vector.load %arg7[%c0, %c0_0, %c0_1] : memref<2x32x22xbf16, #tpu.memory_space<vmem>>, vector<2x32x3xbf16>
    tpu.vector_store %arg7[%c0, %c0_0, %c0_1], %0 {strides = array<i32>} : memref<2x32x22xbf16, #tpu.memory_space<vmem>>, vector<2x32x3xbf16>,
    %cst_2 = arith.constant 0.000000e+00 : bf16
    %2 = vector.broadcast %cst_2 : bf16 to vector<2x32x3xbf16>
    %c0_3 = arith.constant 0 : index
    %c0_4 = arith.constant 0 : index
    %c19 = arith.constant 19 : index
    %3 = vector.load %arg7[%c0_3, %c0_4, %c19] : memref<2x32x22xbf16, #tpu.memory_space<vmem>>, vector<2x32x3xbf16>
    tpu.vector_store %arg7[%c0_3, %c0_4, %c19], %2 {strides = array<i32>} : memref<2x32x22xbf16, #tpu.memory_space<vmem>>, vector<2x32x3xbf16>,
    %c0_5 = arith.constant 0 : index
    %c0_6 = arith.constant 0 : index
    %4 = vector.load %arg2[%c0_5, %c0_6] : memref<32x224xbf16, #tpu.memory_space<vmem>>, vector<32x224xbf16>
    %c0_7 = arith.constant 0 : index
    %c0_8 = arith.constant 0 : index
    %5 = vector.load %arg3[%c0_7, %c0_8] : memref<32x1xf32, #tpu.memory_space<vmem>>, vector<32x1xf32>
    %6 = vector.shape_cast %5 : vector<32x1xf32> to vector<32x1xf32>
    %7 = vector.broadcast %6 : vector<32x1xf32> to vector<32x16xf32>
    %c0_9 = arith.constant 0 : index
    %c0_10 = arith.constant 0 : index
    %8 = vector.load %arg4[%c0_9, %c0_10] : memref<32x1xf32, #tpu.memory_space<vmem>>, vector<32x1xf32>
    %9 = vector.shape_cast %8 : vector<32x1xf32> to vector<32x1xf32>
    %10 = vector.broadcast %9 : vector<32x1xf32> to vector<32x16xf32>
    %c0_11 = arith.constant 0 : index
    %c0_12 = arith.constant 0 : index
    %11 = vector.load %arg5[%c0_11, %c0_12] : memref<32x1xf32, #tpu.memory_space<vmem>>, vector<32x1xf32>
    %12 = vector.shape_cast %11 : vector<32x1xf32> to vector<32x1xf32>
    %13 = vector.broadcast %12 : vector<32x1xf32> to vector<32x16xf32>
    %c0_13 = arith.constant 0 : index
    %c0_14 = arith.constant 0 : index
    %c0_15 = arith.constant 0 : index
    %14 = vector.load %arg1[%c0_13, %c0_14, %c0_15] : memref<2x32x16xf32, #tpu.memory_space<vmem>>, vector<2x32x16xf32>
    %c0_i32 = arith.constant 0 : i32
    %15 = arith.truncf %14 : vector<2x32x16xf32> to vector<2x32x16xbf16>
    %c0_16 = arith.constant 0 : index
    %c0_17 = arith.constant 0 : index
    %c3 = arith.constant 3 : index
    %16 = vector.load %arg7[%c0_16, %c0_17, %c3] : memref<2x32x22xbf16, #tpu.memory_space<vmem>>, vector<2x32x16xbf16>
    tpu.vector_store %arg7[%c0_16, %c0_17, %c3], %15 {strides = array<i32>} : memref<2x32x22xbf16, #tpu.memory_space<vmem>>, vector<2x32x16xbf16>,
    %c0_18 = arith.constant 0 : index
    %c0_19 = arith.constant 0 : index
    %c0_20 = arith.constant 0 : index
    %17 = vector.load %arg7[%c0_18, %c0_19, %c0_20] : memref<2x32x22xbf16, #tpu.memory_space<vmem>>, vector<1x32x16xbf16>
    %18 = vector.shape_cast %17 : vector<1x32x16xbf16> to vector<32x16xbf16>
    %c0_21 = arith.constant 0 : index
    %c0_22 = arith.constant 0 : index
    %c1 = arith.constant 1 : index
    %19 = vector.load %arg7[%c0_21, %c0_22, %c1] : memref<2x32x22xbf16, #tpu.memory_space<vmem>>, vector<1x32x16xbf16>
    %20 = vector.shape_cast %19 : vector<1x32x16xbf16> to vector<32x16xbf16>
    %c0_23 = arith.constant 0 : index
    %c0_24 = arith.constant 0 : index
    %c2 = arith.constant 2 : index
    %21 = vector.load %arg7[%c0_23, %c0_24, %c2] : memref<2x32x22xbf16, #tpu.memory_space<vmem>>, vector<1x32x16xbf16>
    %22 = vector.shape_cast %21 : vector<1x32x16xbf16> to vector<32x16xbf16>
    %c0_25 = arith.constant 0 : index
    %c0_26 = arith.constant 0 : index
    %c3_27 = arith.constant 3 : index
    %23 = vector.load %arg7[%c0_25, %c0_26, %c3_27] : memref<2x32x22xbf16, #tpu.memory_space<vmem>>, vector<1x32x16xbf16>
    %24 = vector.shape_cast %23 : vector<1x32x16xbf16> to vector<32x16xbf16>
    %c0_28 = arith.constant 0 : index
    %c0_29 = arith.constant 0 : index
    %c4 = arith.constant 4 : index
    %25 = vector.load %arg7[%c0_28, %c0_29, %c4] : memref<2x32x22xbf16, #tpu.memory_space<vmem>>, vector<1x32x16xbf16>
    %26 = vector.shape_cast %25 : vector<1x32x16xbf16> to vector<32x16xbf16>
    %c0_30 = arith.constant 0 : index
    %c0_31 = arith.constant 0 : index
    %c5 = arith.constant 5 : index
    %27 = vector.load %arg7[%c0_30, %c0_31, %c5] : memref<2x32x22xbf16, #tpu.memory_space<vmem>>, vector<1x32x16xbf16>
    %28 = vector.shape_cast %27 : vector<1x32x16xbf16> to vector<32x16xbf16>
    %c0_32 = arith.constant 0 : index
    %c0_33 = arith.constant 0 : index
    %c6 = arith.constant 6 : index
    %29 = vector.load %arg7[%c0_32, %c0_33, %c6] : memref<2x32x22xbf16, #tpu.memory_space<vmem>>, vector<1x32x16xbf16>
    %30 = vector.shape_cast %29 : vector<1x32x16xbf16> to vector<32x16xbf16>
    %31 = tpu.concatenate %18, %20, %22, %24, %26, %28, %30 in 0 : vector<32x16xbf16>, vector<32x16xbf16>, vector<32x16xbf16>, vector<32x16xbf16>, vector<32x16xbf16>, vector<32x16xbf16>, vector<32x16xbf16> -> vector<224x16xbf16>
    %cst_34 = arith.constant dense<0.000000e+00> : vector<32x16xf32>
    %32 = tpu.matmul %4, %31, %cst_34 {dimension_numbers = #tpu.dot_dimension_numbers<[1], [0], [0], [1], [0, 0, 1, 1], [], []>} : vector<32x224xbf16>, vector<224x16xbf16>, vector<32x16xf32> -> vector<32x16xf32>
    %c1_35 = arith.constant 1 : index
    %c0_36 = arith.constant 0 : index
    %c0_37 = arith.constant 0 : index
    %33 = vector.load %arg7[%c1_35, %c0_36, %c0_37] : memref<2x32x22xbf16, #tpu.memory_space<vmem>>, vector<1x32x16xbf16>
    %34 = vector.shape_cast %33 : vector<1x32x16xbf16> to vector<32x16xbf16>
    %c1_38 = arith.constant 1 : index
    %c0_39 = arith.constant 0 : index
    %c1_40 = arith.constant 1 : index
    %35 = vector.load %arg7[%c1_38, %c0_39, %c1_40] : memref<2x32x22xbf16, #tpu.memory_space<vmem>>, vector<1x32x16xbf16>
    %36 = vector.shape_cast %35 : vector<1x32x16xbf16> to vector<32x16xbf16>
    %c1_41 = arith.constant 1 : index
    %c0_42 = arith.constant 0 : index
    %c2_43 = arith.constant 2 : index
    %37 = vector.load %arg7[%c1_41, %c0_42, %c2_43] : memref<2x32x22xbf16, #tpu.memory_space<vmem>>, vector<1x32x16xbf16>
    %38 = vector.shape_cast %37 : vector<1x32x16xbf16> to vector<32x16xbf16>
    %c1_44 = arith.constant 1 : index
    %c0_45 = arith.constant 0 : index
    %c3_46 = arith.constant 3 : index
    %39 = vector.load %arg7[%c1_44, %c0_45, %c3_46] : memref<2x32x22xbf16, #tpu.memory_space<vmem>>, vector<1x32x16xbf16>
    %40 = vector.shape_cast %39 : vector<1x32x16xbf16> to vector<32x16xbf16>
    %c1_47 = arith.constant 1 : index
    %c0_48 = arith.constant 0 : index
    %c4_49 = arith.constant 4 : index
    %41 = vector.load %arg7[%c1_47, %c0_48, %c4_49] : memref<2x32x22xbf16, #tpu.memory_space<vmem>>, vector<1x32x16xbf16>
    %42 = vector.shape_cast %41 : vector<1x32x16xbf16> to vector<32x16xbf16>
    %c1_50 = arith.constant 1 : index
    %c0_51 = arith.constant 0 : index
    %c5_52 = arith.constant 5 : index
    %43 = vector.load %arg7[%c1_50, %c0_51, %c5_52] : memref<2x32x22xbf16, #tpu.memory_space<vmem>>, vector<1x32x16xbf16>
    %44 = vector.shape_cast %43 : vector<1x32x16xbf16> to vector<32x16xbf16>
    %c1_53 = arith.constant 1 : index
    %c0_54 = arith.constant 0 : index
    %c6_55 = arith.constant 6 : index
    %45 = vector.load %arg7[%c1_53, %c0_54, %c6_55] : memref<2x32x22xbf16, #tpu.memory_space<vmem>>, vector<1x32x16xbf16>
    %46 = vector.shape_cast %45 : vector<1x32x16xbf16> to vector<32x16xbf16>
    %47 = tpu.concatenate %34, %36, %38, %40, %42, %44, %46 in 0 : vector<32x16xbf16>, vector<32x16xbf16>, vector<32x16xbf16>, vector<32x16xbf16>, vector<32x16xbf16>, vector<32x16xbf16>, vector<32x16xbf16> -> vector<224x16xbf16>
    %cst_56 = arith.constant dense<0.000000e+00> : vector<32x16xf32>
    %48 = tpu.matmul %4, %47, %cst_56 {dimension_numbers = #tpu.dot_dimension_numbers<[1], [0], [0], [1], [0, 0, 1, 1], [], []>} : vector<32x224xbf16>, vector<224x16xbf16>, vector<32x16xf32> -> vector<32x16xf32>
    %49 = vector.shape_cast %32 : vector<32x16xf32> to vector<1x32x16xf32>
    %50 = vector.shape_cast %48 : vector<32x16xf32> to vector<1x32x16xf32>
    %51 = tpu.concatenate %49, %50 in 0 : vector<1x32x16xf32>, vector<1x32x16xf32> -> vector<2x32x16xf32>
    %52 = vector.shape_cast %7 : vector<32x16xf32> to vector<1x32x16xf32>
    %53 = vector.broadcast %52 : vector<1x32x16xf32> to vector<2x32x16xf32>
    %54 = arith.addf %51, %53 : vector<2x32x16xf32>
    %cst_57 = arith.constant 0.000000e+00 : f32
    %55 = vector.broadcast %cst_57 : f32 to vector<2x32x16xf32>
    %56 = arith.maximumf %54, %55 : vector<2x32x16xf32>
    %57 = arith.addf %14, %56 : vector<2x32x16xf32>
    %cst_58 = arith.constant dense<0.000000e+00> : vector<2x16xf32>
    %58 = vector.multi_reduction <add>, %57, %cst_58 [1] : vector<2x32x16xf32> to vector<2x16xf32>
    %59 = vector.shape_cast %58 : vector<2x16xf32> to vector<2x1x16xf32>
    %cst_59 = arith.constant 3.200000e+01 : f32
    %60 = vector.broadcast %cst_59 : f32 to vector<2x1x16xf32>
    %61 = arith.divf %59, %60 : vector<2x1x16xf32>
    %62 = vector.broadcast %61 : vector<2x1x16xf32> to vector<2x32x16xf32>
    %63 = arith.subf %57, %62 : vector<2x32x16xf32>
    %64 = arith.mulf %63, %63 : vector<2x32x16xf32>
    %cst_60 = arith.constant dense<0.000000e+00> : vector<2x16xf32>
    %65 = vector.multi_reduction <add>, %64, %cst_60 [1] : vector<2x32x16xf32> to vector<2x16xf32>
    %66 = vector.shape_cast %65 : vector<2x16xf32> to vector<2x1x16xf32>
    %cst_61 = arith.constant 3.200000e+01 : f32
    %67 = vector.broadcast %cst_61 : f32 to vector<2x1x16xf32>
    %68 = arith.divf %66, %67 : vector<2x1x16xf32>
    %cst_62 = arith.constant 9.99999974E-6 : f32
    %69 = vector.broadcast %cst_62 : f32 to vector<2x1x16xf32>
    %70 = arith.addf %68, %69 : vector<2x1x16xf32>
    %71 = math.rsqrt %70 : vector<2x1x16xf32>
    %72 = vector.broadcast %71 : vector<2x1x16xf32> to vector<2x32x16xf32>
    %73 = arith.mulf %63, %72 : vector<2x32x16xf32>
    %74 = vector.shape_cast %10 : vector<32x16xf32> to vector<1x32x16xf32>
    %75 = vector.broadcast %74 : vector<1x32x16xf32> to vector<2x32x16xf32>
    %76 = arith.mulf %73, %75 : vector<2x32x16xf32>
    %77 = vector.shape_cast %13 : vector<32x16xf32> to vector<1x32x16xf32>
    %78 = vector.broadcast %77 : vector<1x32x16xf32> to vector<2x32x16xf32>
    %79 = arith.addf %76, %78 : vector<2x32x16xf32>
    %c1_i32 = arith.constant 1 : i32
    %80 = arith.truncf %79 : vector<2x32x16xf32> to vector<2x32x16xbf16>
    %c0_63 = arith.constant 0 : index
    %c0_64 = arith.constant 0 : index
    %c3_65 = arith.constant 3 : index
    %81 = vector.load %arg7[%c0_63, %c0_64, %c3_65] : memref<2x32x22xbf16, #tpu.memory_space<vmem>>, vector<2x32x16xbf16>
    tpu.vector_store %arg7[%c0_63, %c0_64, %c3_65], %80 {strides = array<i32>} : memref<2x32x22xbf16, #tpu.memory_space<vmem>>, vector<2x32x16xbf16>,
    %c0_66 = arith.constant 0 : index
    %c0_67 = arith.constant 0 : index
    %c0_68 = arith.constant 0 : index
    %82 = vector.load %arg7[%c0_66, %c0_67, %c0_68] : memref<2x32x22xbf16, #tpu.memory_space<vmem>>, vector<1x32x16xbf16>
    %83 = vector.shape_cast %82 : vector<1x32x16xbf16> to vector<32x16xbf16>
    %c0_69 = arith.constant 0 : index
    %c0_70 = arith.constant 0 : index
    %c1_71 = arith.constant 1 : index
    %84 = vector.load %arg7[%c0_69, %c0_70, %c1_71] : memref<2x32x22xbf16, #tpu.memory_space<vmem>>, vector<1x32x16xbf16>
    %85 = vector.shape_cast %84 : vector<1x32x16xbf16> to vector<32x16xbf16>
    %c0_72 = arith.constant 0 : index
    %c0_73 = arith.constant 0 : index
    %c2_74 = arith.constant 2 : index
    %86 = vector.load %arg7[%c0_72, %c0_73, %c2_74] : memref<2x32x22xbf16, #tpu.memory_space<vmem>>, vector<1x32x16xbf16>
    %87 = vector.shape_cast %86 : vector<1x32x16xbf16> to vector<32x16xbf16>
    %c0_75 = arith.constant 0 : index
    %c0_76 = arith.constant 0 : index
    %c3_77 = arith.constant 3 : index
    %88 = vector.load %arg7[%c0_75, %c0_76, %c3_77] : memref<2x32x22xbf16, #tpu.memory_space<vmem>>, vector<1x32x16xbf16>
    %89 = vector.shape_cast %88 : vector<1x32x16xbf16> to vector<32x16xbf16>
    %c0_78 = arith.constant 0 : index
    %c0_79 = arith.constant 0 : index
    %c4_80 = arith.constant 4 : index
    %90 = vector.load %arg7[%c0_78, %c0_79, %c4_80] : memref<2x32x22xbf16, #tpu.memory_space<vmem>>, vector<1x32x16xbf16>
    %91 = vector.shape_cast %90 : vector<1x32x16xbf16> to vector<32x16xbf16>
    %c0_81 = arith.constant 0 : index
    %c0_82 = arith.constant 0 : index
    %c5_83 = arith.constant 5 : index
    %92 = vector.load %arg7[%c0_81, %c0_82, %c5_83] : memref<2x32x22xbf16, #tpu.memory_space<vmem>>, vector<1x32x16xbf16>
    %93 = vector.shape_cast %92 : vector<1x32x16xbf16> to vector<32x16xbf16>
    %c0_84 = arith.constant 0 : index
    %c0_85 = arith.constant 0 : index
    %c6_86 = arith.constant 6 : index
    %94 = vector.load %arg7[%c0_84, %c0_85, %c6_86] : memref<2x32x22xbf16, #tpu.memory_space<vmem>>, vector<1x32x16xbf16>
    %95 = vector.shape_cast %94 : vector<1x32x16xbf16> to vector<32x16xbf16>
    %96 = tpu.concatenate %83, %85, %87, %89, %91, %93, %95 in 0 : vector<32x16xbf16>, vector<32x16xbf16>, vector<32x16xbf16>, vector<32x16xbf16>, vector<32x16xbf16>, vector<32x16xbf16>, vector<32x16xbf16> -> vector<224x16xbf16>
    %cst_87 = arith.constant dense<0.000000e+00> : vector<32x16xf32>
    %97 = tpu.matmul %4, %96, %cst_87 {dimension_numbers = #tpu.dot_dimension_numbers<[1], [0], [0], [1], [0, 0, 1, 1], [], []>} : vector<32x224xbf16>, vector<224x16xbf16>, vector<32x16xf32> -> vector<32x16xf32>
    %c1_88 = arith.constant 1 : index
    %c0_89 = arith.constant 0 : index
    %c0_90 = arith.constant 0 : index
    %98 = vector.load %arg7[%c1_88, %c0_89, %c0_90] : memref<2x32x22xbf16, #tpu.memory_space<vmem>>, vector<1x32x16xbf16>
    %99 = vector.shape_cast %98 : vector<1x32x16xbf16> to vector<32x16xbf16>
    %c1_91 = arith.constant 1 : index
    %c0_92 = arith.constant 0 : index
    %c1_93 = arith.constant 1 : index
    %100 = vector.load %arg7[%c1_91, %c0_92, %c1_93] : memref<2x32x22xbf16, #tpu.memory_space<vmem>>, vector<1x32x16xbf16>
    %101 = vector.shape_cast %100 : vector<1x32x16xbf16> to vector<32x16xbf16>
    %c1_94 = arith.constant 1 : index
    %c0_95 = arith.constant 0 : index
    %c2_96 = arith.constant 2 : index
    %102 = vector.load %arg7[%c1_94, %c0_95, %c2_96] : memref<2x32x22xbf16, #tpu.memory_space<vmem>>, vector<1x32x16xbf16>
    %103 = vector.shape_cast %102 : vector<1x32x16xbf16> to vector<32x16xbf16>
    %c1_97 = arith.constant 1 : index
    %c0_98 = arith.constant 0 : index
    %c3_99 = arith.constant 3 : index
    %104 = vector.load %arg7[%c1_97, %c0_98, %c3_99] : memref<2x32x22xbf16, #tpu.memory_space<vmem>>, vector<1x32x16xbf16>
    %105 = vector.shape_cast %104 : vector<1x32x16xbf16> to vector<32x16xbf16>
    %c1_100 = arith.constant 1 : index
    %c0_101 = arith.constant 0 : index
    %c4_102 = arith.constant 4 : index
    %106 = vector.load %arg7[%c1_100, %c0_101, %c4_102] : memref<2x32x22xbf16, #tpu.memory_space<vmem>>, vector<1x32x16xbf16>
    %107 = vector.shape_cast %106 : vector<1x32x16xbf16> to vector<32x16xbf16>
    %c1_103 = arith.constant 1 : index
    %c0_104 = arith.constant 0 : index
    %c5_105 = arith.constant 5 : index
    %108 = vector.load %arg7[%c1_103, %c0_104, %c5_105] : memref<2x32x22xbf16, #tpu.memory_space<vmem>>, vector<1x32x16xbf16>
    %109 = vector.shape_cast %108 : vector<1x32x16xbf16> to vector<32x16xbf16>
    %c1_106 = arith.constant 1 : index
    %c0_107 = arith.constant 0 : index
    %c6_108 = arith.constant 6 : index
    %110 = vector.load %arg7[%c1_106, %c0_107, %c6_108] : memref<2x32x22xbf16, #tpu.memory_space<vmem>>, vector<1x32x16xbf16>
    %111 = vector.shape_cast %110 : vector<1x32x16xbf16> to vector<32x16xbf16>
    %112 = tpu.concatenate %99, %101, %103, %105, %107, %109, %111 in 0 : vector<32x16xbf16>, vector<32x16xbf16>, vector<32x16xbf16>, vector<32x16xbf16>, vector<32x16xbf16>, vector<32x16xbf16>, vector<32x16xbf16> -> vector<224x16xbf16>
    %cst_109 = arith.constant dense<0.000000e+00> : vector<32x16xf32>
    %113 = tpu.matmul %4, %112, %cst_109 {dimension_numbers = #tpu.dot_dimension_numbers<[1], [0], [0], [1], [0, 0, 1, 1], [], []>} : vector<32x224xbf16>, vector<224x16xbf16>, vector<32x16xf32> -> vector<32x16xf32>
    %114 = vector.shape_cast %97 : vector<32x16xf32> to vector<1x32x16xf32>
    %115 = vector.shape_cast %113 : vector<32x16xf32> to vector<1x32x16xf32>
    %116 = tpu.concatenate %114, %115 in 0 : vector<1x32x16xf32>, vector<1x32x16xf32> -> vector<2x32x16xf32>
    %117 = vector.shape_cast %7 : vector<32x16xf32> to vector<1x32x16xf32>
    %118 = vector.broadcast %117 : vector<1x32x16xf32> to vector<2x32x16xf32>
    %119 = arith.addf %116, %118 : vector<2x32x16xf32>
    %cst_110 = arith.constant 0.000000e+00 : f32
    %120 = vector.broadcast %cst_110 : f32 to vector<2x32x16xf32>
    %121 = arith.maximumf %119, %120 : vector<2x32x16xf32>
    %122 = arith.addf %79, %121 : vector<2x32x16xf32>
    %cst_111 = arith.constant dense<0.000000e+00> : vector<2x16xf32>
    %123 = vector.multi_reduction <add>, %122, %cst_111 [1] : vector<2x32x16xf32> to vector<2x16xf32>
    %124 = vector.shape_cast %123 : vector<2x16xf32> to vector<2x1x16xf32>
    %cst_112 = arith.constant 3.200000e+01 : f32
    %125 = vector.broadcast %cst_112 : f32 to vector<2x1x16xf32>
    %126 = arith.divf %124, %125 : vector<2x1x16xf32>
    %127 = vector.broadcast %126 : vector<2x1x16xf32> to vector<2x32x16xf32>
    %128 = arith.subf %122, %127 : vector<2x32x16xf32>
    %129 = arith.mulf %128, %128 : vector<2x32x16xf32>
    %cst_113 = arith.constant dense<0.000000e+00> : vector<2x16xf32>
    %130 = vector.multi_reduction <add>, %129, %cst_113 [1] : vector<2x32x16xf32> to vector<2x16xf32>
    %131 = vector.shape_cast %130 : vector<2x16xf32> to vector<2x1x16xf32>
    %cst_114 = arith.constant 3.200000e+01 : f32
    %132 = vector.broadcast %cst_114 : f32 to vector<2x1x16xf32>
    %133 = arith.divf %131, %132 : vector<2x1x16xf32>
    %cst_115 = arith.constant 9.99999974E-6 : f32
    %134 = vector.broadcast %cst_115 : f32 to vector<2x1x16xf32>
    %135 = arith.addf %133, %134 : vector<2x1x16xf32>
    %136 = math.rsqrt %135 : vector<2x1x16xf32>
    %137 = vector.broadcast %136 : vector<2x1x16xf32> to vector<2x32x16xf32>
    %138 = arith.mulf %128, %137 : vector<2x32x16xf32>
    %139 = vector.shape_cast %10 : vector<32x16xf32> to vector<1x32x16xf32>
    %140 = vector.broadcast %139 : vector<1x32x16xf32> to vector<2x32x16xf32>
    %141 = arith.mulf %138, %140 : vector<2x32x16xf32>
    %142 = vector.shape_cast %13 : vector<32x16xf32> to vector<1x32x16xf32>
    %143 = vector.broadcast %142 : vector<1x32x16xf32> to vector<2x32x16xf32>
    %144 = arith.addf %141, %143 : vector<2x32x16xf32>
    %c2_i32 = arith.constant 2 : i32
    %145 = arith.truncf %144 : vector<2x32x16xf32> to vector<2x32x16xbf16>
    %c0_116 = arith.constant 0 : index
    %c0_117 = arith.constant 0 : index
    %c3_118 = arith.constant 3 : index
    %146 = vector.load %arg7[%c0_116, %c0_117, %c3_118] : memref<2x32x22xbf16, #tpu.memory_space<vmem>>, vector<2x32x16xbf16>
    tpu.vector_store %arg7[%c0_116, %c0_117, %c3_118], %145 {strides = array<i32>} : memref<2x32x22xbf16, #tpu.memory_space<vmem>>, vector<2x32x16xbf16>,
    %c0_119 = arith.constant 0 : index
    %c0_120 = arith.constant 0 : index
    %c0_121 = arith.constant 0 : index
    %147 = vector.load %arg7[%c0_119, %c0_120, %c0_121] : memref<2x32x22xbf16, #tpu.memory_space<vmem>>, vector<1x32x16xbf16>
    %148 = vector.shape_cast %147 : vector<1x32x16xbf16> to vector<32x16xbf16>
    %c0_122 = arith.constant 0 : index
    %c0_123 = arith.constant 0 : index
    %c1_124 = arith.constant 1 : index
    %149 = vector.load %arg7[%c0_122, %c0_123, %c1_124] : memref<2x32x22xbf16, #tpu.memory_space<vmem>>, vector<1x32x16xbf16>
    %150 = vector.shape_cast %149 : vector<1x32x16xbf16> to vector<32x16xbf16>
    %c0_125 = arith.constant 0 : index
    %c0_126 = arith.constant 0 : index
    %c2_127 = arith.constant 2 : index
    %151 = vector.load %arg7[%c0_125, %c0_126, %c2_127] : memref<2x32x22xbf16, #tpu.memory_space<vmem>>, vector<1x32x16xbf16>
    %152 = vector.shape_cast %151 : vector<1x32x16xbf16> to vector<32x16xbf16>
    %c0_128 = arith.constant 0 : index
    %c0_129 = arith.constant 0 : index
    %c3_130 = arith.constant 3 : index
    %153 = vector.load %arg7[%c0_128, %c0_129, %c3_130] : memref<2x32x22xbf16, #tpu.memory_space<vmem>>, vector<1x32x16xbf16>
    %154 = vector.shape_cast %153 : vector<1x32x16xbf16> to vector<32x16xbf16>
    %c0_131 = arith.constant 0 : index
    %c0_132 = arith.constant 0 : index
    %c4_133 = arith.constant 4 : index
    %155 = vector.load %arg7[%c0_131, %c0_132, %c4_133] : memref<2x32x22xbf16, #tpu.memory_space<vmem>>, vector<1x32x16xbf16>
    %156 = vector.shape_cast %155 : vector<1x32x16xbf16> to vector<32x16xbf16>
    %c0_134 = arith.constant 0 : index
    %c0_135 = arith.constant 0 : index
    %c5_136 = arith.constant 5 : index
    %157 = vector.load %arg7[%c0_134, %c0_135, %c5_136] : memref<2x32x22xbf16, #tpu.memory_space<vmem>>, vector<1x32x16xbf16>
    %158 = vector.shape_cast %157 : vector<1x32x16xbf16> to vector<32x16xbf16>
    %c0_137 = arith.constant 0 : index
    %c0_138 = arith.constant 0 : index
    %c6_139 = arith.constant 6 : index
    %159 = vector.load %arg7[%c0_137, %c0_138, %c6_139] : memref<2x32x22xbf16, #tpu.memory_space<vmem>>, vector<1x32x16xbf16>
    %160 = vector.shape_cast %159 : vector<1x32x16xbf16> to vector<32x16xbf16>
    %161 = tpu.concatenate %148, %150, %152, %154, %156, %158, %160 in 0 : vector<32x16xbf16>, vector<32x16xbf16>, vector<32x16xbf16>, vector<32x16xbf16>, vector<32x16xbf16>, vector<32x16xbf16>, vector<32x16xbf16> -> vector<224x16xbf16>
    %cst_140 = arith.constant dense<0.000000e+00> : vector<32x16xf32>
    %162 = tpu.matmul %4, %161, %cst_140 {dimension_numbers = #tpu.dot_dimension_numbers<[1], [0], [0], [1], [0, 0, 1, 1], [], []>} : vector<32x224xbf16>, vector<224x16xbf16>, vector<32x16xf32> -> vector<32x16xf32>
    %c1_141 = arith.constant 1 : index
    %c0_142 = arith.constant 0 : index
    %c0_143 = arith.constant 0 : index
    %163 = vector.load %arg7[%c1_141, %c0_142, %c0_143] : memref<2x32x22xbf16, #tpu.memory_space<vmem>>, vector<1x32x16xbf16>
    %164 = vector.shape_cast %163 : vector<1x32x16xbf16> to vector<32x16xbf16>
    %c1_144 = arith.constant 1 : index
    %c0_145 = arith.constant 0 : index
    %c1_146 = arith.constant 1 : index
    %165 = vector.load %arg7[%c1_144, %c0_145, %c1_146] : memref<2x32x22xbf16, #tpu.memory_space<vmem>>, vector<1x32x16xbf16>
    %166 = vector.shape_cast %165 : vector<1x32x16xbf16> to vector<32x16xbf16>
    %c1_147 = arith.constant 1 : index
    %c0_148 = arith.constant 0 : index
    %c2_149 = arith.constant 2 : index
    %167 = vector.load %arg7[%c1_147, %c0_148, %c2_149] : memref<2x32x22xbf16, #tpu.memory_space<vmem>>, vector<1x32x16xbf16>
    %168 = vector.shape_cast %167 : vector<1x32x16xbf16> to vector<32x16xbf16>
    %c1_150 = arith.constant 1 : index
    %c0_151 = arith.constant 0 : index
    %c3_152 = arith.constant 3 : index
    %169 = vector.load %arg7[%c1_150, %c0_151, %c3_152] : memref<2x32x22xbf16, #tpu.memory_space<vmem>>, vector<1x32x16xbf16>
    %170 = vector.shape_cast %169 : vector<1x32x16xbf16> to vector<32x16xbf16>
    %c1_153 = arith.constant 1 : index
    %c0_154 = arith.constant 0 : index
    %c4_155 = arith.constant 4 : index
    %171 = vector.load %arg7[%c1_153, %c0_154, %c4_155] : memref<2x32x22xbf16, #tpu.memory_space<vmem>>, vector<1x32x16xbf16>
    %172 = vector.shape_cast %171 : vector<1x32x16xbf16> to vector<32x16xbf16>
    %c1_156 = arith.constant 1 : index
    %c0_157 = arith.constant 0 : index
    %c5_158 = arith.constant 5 : index
    %173 = vector.load %arg7[%c1_156, %c0_157, %c5_158] : memref<2x32x22xbf16, #tpu.memory_space<vmem>>, vector<1x32x16xbf16>
    %174 = vector.shape_cast %173 : vector<1x32x16xbf16> to vector<32x16xbf16>
    %c1_159 = arith.constant 1 : index
    %c0_160 = arith.constant 0 : index
    %c6_161 = arith.constant 6 : index
    %175 = vector.load %arg7[%c1_159, %c0_160, %c6_161] : memref<2x32x22xbf16, #tpu.memory_space<vmem>>, vector<1x32x16xbf16>
    %176 = vector.shape_cast %175 : vector<1x32x16xbf16> to vector<32x16xbf16>
    %177 = tpu.concatenate %164, %166, %168, %170, %172, %174, %176 in 0 : vector<32x16xbf16>, vector<32x16xbf16>, vector<32x16xbf16>, vector<32x16xbf16>, vector<32x16xbf16>, vector<32x16xbf16>, vector<32x16xbf16> -> vector<224x16xbf16>
    %cst_162 = arith.constant dense<0.000000e+00> : vector<32x16xf32>
    %178 = tpu.matmul %4, %177, %cst_162 {dimension_numbers = #tpu.dot_dimension_numbers<[1], [0], [0], [1], [0, 0, 1, 1], [], []>} : vector<32x224xbf16>, vector<224x16xbf16>, vector<32x16xf32> -> vector<32x16xf32>
    %179 = vector.shape_cast %162 : vector<32x16xf32> to vector<1x32x16xf32>
    %180 = vector.shape_cast %178 : vector<32x16xf32> to vector<1x32x16xf32>
    %181 = tpu.concatenate %179, %180 in 0 : vector<1x32x16xf32>, vector<1x32x16xf32> -> vector<2x32x16xf32>
    %182 = vector.shape_cast %7 : vector<32x16xf32> to vector<1x32x16xf32>
    %183 = vector.broadcast %182 : vector<1x32x16xf32> to vector<2x32x16xf32>
    %184 = arith.addf %181, %183 : vector<2x32x16xf32>
    %cst_163 = arith.constant 0.000000e+00 : f32
    %185 = vector.broadcast %cst_163 : f32 to vector<2x32x16xf32>
    %186 = arith.maximumf %184, %185 : vector<2x32x16xf32>
    %187 = arith.addf %144, %186 : vector<2x32x16xf32>
    %cst_164 = arith.constant dense<0.000000e+00> : vector<2x16xf32>
    %188 = vector.multi_reduction <add>, %187, %cst_164 [1] : vector<2x32x16xf32> to vector<2x16xf32>
    %189 = vector.shape_cast %188 : vector<2x16xf32> to vector<2x1x16xf32>
    %cst_165 = arith.constant 3.200000e+01 : f32
    %190 = vector.broadcast %cst_165 : f32 to vector<2x1x16xf32>
    %191 = arith.divf %189, %190 : vector<2x1x16xf32>
    %192 = vector.broadcast %191 : vector<2x1x16xf32> to vector<2x32x16xf32>
    %193 = arith.subf %187, %192 : vector<2x32x16xf32>
    %194 = arith.mulf %193, %193 : vector<2x32x16xf32>
    %cst_166 = arith.constant dense<0.000000e+00> : vector<2x16xf32>
    %195 = vector.multi_reduction <add>, %194, %cst_166 [1] : vector<2x32x16xf32> to vector<2x16xf32>
    %196 = vector.shape_cast %195 : vector<2x16xf32> to vector<2x1x16xf32>
    %cst_167 = arith.constant 3.200000e+01 : f32
    %197 = vector.broadcast %cst_167 : f32 to vector<2x1x16xf32>
    %198 = arith.divf %196, %197 : vector<2x1x16xf32>
    %cst_168 = arith.constant 9.99999974E-6 : f32
    %199 = vector.broadcast %cst_168 : f32 to vector<2x1x16xf32>
    %200 = arith.addf %198, %199 : vector<2x1x16xf32>
    %201 = math.rsqrt %200 : vector<2x1x16xf32>
    %202 = vector.broadcast %201 : vector<2x1x16xf32> to vector<2x32x16xf32>
    %203 = arith.mulf %193, %202 : vector<2x32x16xf32>
    %204 = vector.shape_cast %10 : vector<32x16xf32> to vector<1x32x16xf32>
    %205 = vector.broadcast %204 : vector<1x32x16xf32> to vector<2x32x16xf32>
    %206 = arith.mulf %203, %205 : vector<2x32x16xf32>
    %207 = vector.shape_cast %13 : vector<32x16xf32> to vector<1x32x16xf32>
    %208 = vector.broadcast %207 : vector<1x32x16xf32> to vector<2x32x16xf32>
    %209 = arith.addf %206, %208 : vector<2x32x16xf32>
    %c3_i32 = arith.constant 3 : i32
    %210 = arith.truncf %209 : vector<2x32x16xf32> to vector<2x32x16xbf16>
    %c0_169 = arith.constant 0 : index
    %c0_170 = arith.constant 0 : index
    %c3_171 = arith.constant 3 : index
    %211 = vector.load %arg7[%c0_169, %c0_170, %c3_171] : memref<2x32x22xbf16, #tpu.memory_space<vmem>>, vector<2x32x16xbf16>
    tpu.vector_store %arg7[%c0_169, %c0_170, %c3_171], %210 {strides = array<i32>} : memref<2x32x22xbf16, #tpu.memory_space<vmem>>, vector<2x32x16xbf16>,
    %c0_172 = arith.constant 0 : index
    %c0_173 = arith.constant 0 : index
    %c0_174 = arith.constant 0 : index
    %212 = vector.load %arg7[%c0_172, %c0_173, %c0_174] : memref<2x32x22xbf16, #tpu.memory_space<vmem>>, vector<1x32x16xbf16>
    %213 = vector.shape_cast %212 : vector<1x32x16xbf16> to vector<32x16xbf16>
    %c0_175 = arith.constant 0 : index
    %c0_176 = arith.constant 0 : index
    %c1_177 = arith.constant 1 : index
    %214 = vector.load %arg7[%c0_175, %c0_176, %c1_177] : memref<2x32x22xbf16, #tpu.memory_space<vmem>>, vector<1x32x16xbf16>
    %215 = vector.shape_cast %214 : vector<1x32x16xbf16> to vector<32x16xbf16>
    %c0_178 = arith.constant 0 : index
    %c0_179 = arith.constant 0 : index
    %c2_180 = arith.constant 2 : index
    %216 = vector.load %arg7[%c0_178, %c0_179, %c2_180] : memref<2x32x22xbf16, #tpu.memory_space<vmem>>, vector<1x32x16xbf16>
    %217 = vector.shape_cast %216 : vector<1x32x16xbf16> to vector<32x16xbf16>
    %c0_181 = arith.constant 0 : index
    %c0_182 = arith.constant 0 : index
    %c3_183 = arith.constant 3 : index
    %218 = vector.load %arg7[%c0_181, %c0_182, %c3_183] : memref<2x32x22xbf16, #tpu.memory_space<vmem>>, vector<1x32x16xbf16>
    %219 = vector.shape_cast %218 : vector<1x32x16xbf16> to vector<32x16xbf16>
    %c0_184 = arith.constant 0 : index
    %c0_185 = arith.constant 0 : index
    %c4_186 = arith.constant 4 : index
    %220 = vector.load %arg7[%c0_184, %c0_185, %c4_186] : memref<2x32x22xbf16, #tpu.memory_space<vmem>>, vector<1x32x16xbf16>
    %221 = vector.shape_cast %220 : vector<1x32x16xbf16> to vector<32x16xbf16>
    %c0_187 = arith.constant 0 : index
    %c0_188 = arith.constant 0 : index
    %c5_189 = arith.constant 5 : index
    %222 = vector.load %arg7[%c0_187, %c0_188, %c5_189] : memref<2x32x22xbf16, #tpu.memory_space<vmem>>, vector<1x32x16xbf16>
    %223 = vector.shape_cast %222 : vector<1x32x16xbf16> to vector<32x16xbf16>
    %c0_190 = arith.constant 0 : index
    %c0_191 = arith.constant 0 : index
    %c6_192 = arith.constant 6 : index
    %224 = vector.load %arg7[%c0_190, %c0_191, %c6_192] : memref<2x32x22xbf16, #tpu.memory_space<vmem>>, vector<1x32x16xbf16>
    %225 = vector.shape_cast %224 : vector<1x32x16xbf16> to vector<32x16xbf16>
    %226 = tpu.concatenate %213, %215, %217, %219, %221, %223, %225 in 0 : vector<32x16xbf16>, vector<32x16xbf16>, vector<32x16xbf16>, vector<32x16xbf16>, vector<32x16xbf16>, vector<32x16xbf16>, vector<32x16xbf16> -> vector<224x16xbf16>
    %cst_193 = arith.constant dense<0.000000e+00> : vector<32x16xf32>
    %227 = tpu.matmul %4, %226, %cst_193 {dimension_numbers = #tpu.dot_dimension_numbers<[1], [0], [0], [1], [0, 0, 1, 1], [], []>} : vector<32x224xbf16>, vector<224x16xbf16>, vector<32x16xf32> -> vector<32x16xf32>
    %c1_194 = arith.constant 1 : index
    %c0_195 = arith.constant 0 : index
    %c0_196 = arith.constant 0 : index
    %228 = vector.load %arg7[%c1_194, %c0_195, %c0_196] : memref<2x32x22xbf16, #tpu.memory_space<vmem>>, vector<1x32x16xbf16>
    %229 = vector.shape_cast %228 : vector<1x32x16xbf16> to vector<32x16xbf16>
    %c1_197 = arith.constant 1 : index
    %c0_198 = arith.constant 0 : index
    %c1_199 = arith.constant 1 : index
    %230 = vector.load %arg7[%c1_197, %c0_198, %c1_199] : memref<2x32x22xbf16, #tpu.memory_space<vmem>>, vector<1x32x16xbf16>
    %231 = vector.shape_cast %230 : vector<1x32x16xbf16> to vector<32x16xbf16>
    %c1_200 = arith.constant 1 : index
    %c0_201 = arith.constant 0 : index
    %c2_202 = arith.constant 2 : index
    %232 = vector.load %arg7[%c1_200, %c0_201, %c2_202] : memref<2x32x22xbf16, #tpu.memory_space<vmem>>, vector<1x32x16xbf16>
    %233 = vector.shape_cast %232 : vector<1x32x16xbf16> to vector<32x16xbf16>
    %c1_203 = arith.constant 1 : index
    %c0_204 = arith.constant 0 : index
    %c3_205 = arith.constant 3 : index
    %234 = vector.load %arg7[%c1_203, %c0_204, %c3_205] : memref<2x32x22xbf16, #tpu.memory_space<vmem>>, vector<1x32x16xbf16>
    %235 = vector.shape_cast %234 : vector<1x32x16xbf16> to vector<32x16xbf16>
    %c1_206 = arith.constant 1 : index
    %c0_207 = arith.constant 0 : index
    %c4_208 = arith.constant 4 : index
    %236 = vector.load %arg7[%c1_206, %c0_207, %c4_208] : memref<2x32x22xbf16, #tpu.memory_space<vmem>>, vector<1x32x16xbf16>
    %237 = vector.shape_cast %236 : vector<1x32x16xbf16> to vector<32x16xbf16>
    %c1_209 = arith.constant 1 : index
    %c0_210 = arith.constant 0 : index
    %c5_211 = arith.constant 5 : index
    %238 = vector.load %arg7[%c1_209, %c0_210, %c5_211] : memref<2x32x22xbf16, #tpu.memory_space<vmem>>, vector<1x32x16xbf16>
    %239 = vector.shape_cast %238 : vector<1x32x16xbf16> to vector<32x16xbf16>
    %c1_212 = arith.constant 1 : index
    %c0_213 = arith.constant 0 : index
    %c6_214 = arith.constant 6 : index
    %240 = vector.load %arg7[%c1_212, %c0_213, %c6_214] : memref<2x32x22xbf16, #tpu.memory_space<vmem>>, vector<1x32x16xbf16>
    %241 = vector.shape_cast %240 : vector<1x32x16xbf16> to vector<32x16xbf16>
    %242 = tpu.concatenate %229, %231, %233, %235, %237, %239, %241 in 0 : vector<32x16xbf16>, vector<32x16xbf16>, vector<32x16xbf16>, vector<32x16xbf16>, vector<32x16xbf16>, vector<32x16xbf16>, vector<32x16xbf16> -> vector<224x16xbf16>
    %cst_215 = arith.constant dense<0.000000e+00> : vector<32x16xf32>
    %243 = tpu.matmul %4, %242, %cst_215 {dimension_numbers = #tpu.dot_dimension_numbers<[1], [0], [0], [1], [0, 0, 1, 1], [], []>} : vector<32x224xbf16>, vector<224x16xbf16>, vector<32x16xf32> -> vector<32x16xf32>
    %244 = vector.shape_cast %227 : vector<32x16xf32> to vector<1x32x16xf32>
    %245 = vector.shape_cast %243 : vector<32x16xf32> to vector<1x32x16xf32>
    %246 = tpu.concatenate %244, %245 in 0 : vector<1x32x16xf32>, vector<1x32x16xf32> -> vector<2x32x16xf32>
    %247 = vector.shape_cast %7 : vector<32x16xf32> to vector<1x32x16xf32>
    %248 = vector.broadcast %247 : vector<1x32x16xf32> to vector<2x32x16xf32>
    %249 = arith.addf %246, %248 : vector<2x32x16xf32>
    %cst_216 = arith.constant 0.000000e+00 : f32
    %250 = vector.broadcast %cst_216 : f32 to vector<2x32x16xf32>
    %251 = arith.maximumf %249, %250 : vector<2x32x16xf32>
    %252 = arith.addf %209, %251 : vector<2x32x16xf32>
    %cst_217 = arith.constant dense<0.000000e+00> : vector<2x16xf32>
    %253 = vector.multi_reduction <add>, %252, %cst_217 [1] : vector<2x32x16xf32> to vector<2x16xf32>
    %254 = vector.shape_cast %253 : vector<2x16xf32> to vector<2x1x16xf32>
    %cst_218 = arith.constant 3.200000e+01 : f32
    %255 = vector.broadcast %cst_218 : f32 to vector<2x1x16xf32>
    %256 = arith.divf %254, %255 : vector<2x1x16xf32>
    %257 = vector.broadcast %256 : vector<2x1x16xf32> to vector<2x32x16xf32>
    %258 = arith.subf %252, %257 : vector<2x32x16xf32>
    %259 = arith.mulf %258, %258 : vector<2x32x16xf32>
    %cst_219 = arith.constant dense<0.000000e+00> : vector<2x16xf32>
    %260 = vector.multi_reduction <add>, %259, %cst_219 [1] : vector<2x32x16xf32> to vector<2x16xf32>
    %261 = vector.shape_cast %260 : vector<2x16xf32> to vector<2x1x16xf32>
    %cst_220 = arith.constant 3.200000e+01 : f32
    %262 = vector.broadcast %cst_220 : f32 to vector<2x1x16xf32>
    %263 = arith.divf %261, %262 : vector<2x1x16xf32>
    %cst_221 = arith.constant 9.99999974E-6 : f32
    %264 = vector.broadcast %cst_221 : f32 to vector<2x1x16xf32>
    %265 = arith.addf %263, %264 : vector<2x1x16xf32>
    %266 = math.rsqrt %265 : vector<2x1x16xf32>
    %267 = vector.broadcast %266 : vector<2x1x16xf32> to vector<2x32x16xf32>
    %268 = arith.mulf %258, %267 : vector<2x32x16xf32>
    %269 = vector.shape_cast %10 : vector<32x16xf32> to vector<1x32x16xf32>
    %270 = vector.broadcast %269 : vector<1x32x16xf32> to vector<2x32x16xf32>
    %271 = arith.mulf %268, %270 : vector<2x32x16xf32>
    %272 = vector.shape_cast %13 : vector<32x16xf32> to vector<1x32x16xf32>
    %273 = vector.broadcast %272 : vector<1x32x16xf32> to vector<2x32x16xf32>
    %274 = arith.addf %271, %273 : vector<2x32x16xf32>
    %c0_222 = arith.constant 0 : index
    %c0_223 = arith.constant 0 : index
    %c0_224 = arith.constant 0 : index
    %275 = vector.load %arg6[%c0_222, %c0_223, %c0_224] : memref<2x32x16xf32, #tpu.memory_space<vmem>>, vector<2x32x16xf32>
    tpu.vector_store %arg6[%c0_222, %c0_223, %c0_224], %274 {strides = array<i32>} : memref<2x32x16xf32, #tpu.memory_space<vmem>>, vector<2x32x16xf32>,
    return
  }
  func.func @transform_0(%arg0: i32) -> (i32, i32, i32) {
    %c0_i32 = arith.constant 0 : i32
    %c0_i32_0 = arith.constant 0 : i32
    %c0_i32_1 = arith.constant 0 : i32
    return %arg0, %c0_i32, %c0_i32_0 : i32, i32, i32
  }
  func.func @transform_1(%arg0: i32) -> (i32, i32) {
    %c0_i32 = arith.constant 0 : i32
    %c0_i32_0 = arith.constant 0 : i32
    %c0_i32_1 = arith.constant 0 : i32
    return %c0_i32, %c0_i32_0 : i32, i32
  }
  func.func @transform_2(%arg0: i32) -> (i32, i32) {
    %c0_i32 = arith.constant 0 : i32
    %c0_i32_0 = arith.constant 0 : i32
    %c0_i32_1 = arith.constant 0 : i32
    return %c0_i32, %c0_i32_0 : i32, i32
  }
  func.func @transform_3(%arg0: i32) -> (i32, i32) {
    %c0_i32 = arith.constant 0 : i32
    %c0_i32_0 = arith.constant 0 : i32
    %c0_i32_1 = arith.constant 0 : i32
    return %c0_i32, %c0_i32_0 : i32, i32
  }
  func.func @transform_4(%arg0: i32) -> (i32, i32) {
    %c0_i32 = arith.constant 0 : i32
    %c0_i32_0 = arith.constant 0 : i32
    %c0_i32_1 = arith.constant 0 : i32
    return %c0_i32, %c0_i32_0 : i32, i32
  }
  func.func @transform_5(%arg0: i32) -> (i32, i32, i32) {
    %c0_i32 = arith.constant 0 : i32
    %c0_i32_0 = arith.constant 0 : i32
    %c0_i32_1 = arith.constant 0 : i32
    return %arg0, %c0_i32, %c0_i32_0 : i32, i32, i32
  }
}

</mosaic_0001>

<bundles_post_ra>
// kernel: tpu_custom_call.1
= control target key start
LH: loop header
LB: loop body
LE: loop exit
PB: predicated region body
PF: predicated region fallthrough
CT: control target
= control target key end

     0   :  { %vm21_vm0 = vcmask 19456   ;;  %v1796_v2 = vmov 0   ;;  %vm30_vm1 = vcmask 175256   ;;  %s1797_s24 = smov 3   ;;  %vm103_vm2 = vcmask 150552   ;;  %s1799_s10 = smov 126   ;;  %s2754_s0 = inlined_call_operand.vmem [shape: f32[2,32,16], index: 0, kind: input, shape index: {}]   ;;  %s2755_s2 = inlined_call_operand.vmem [shape: f32[32,1], index: 2, kind: input, shape index: {}]   ;;  %s2756_s1 = inlined_call_operand.vmem [shape: bf16[32,224], index: 1, kind: input, shape index: {}]   ;;  %s2757_s3 = inlined_call_operand.vmem [shape: f32[32,1], index: 3, kind: input, shape index: {}]   ;;  %s2758_s4 = inlined_call_operand.vmem [shape: f32[32,1], index: 4, kind: input, shape index: {}]   ;;  %s2759_s5 = inlined_call_operand.vmem [shape: f32[2,32,16], index: 5, kind: output, shape index: {}]  }
   0x1   :  { %v1838_v0 = vld [vmem:[%s2754_s0 + $0x30] sm:$0xff]  ;;  %v1843_v1 = vld [vmem:[%s2754_s0 + $0x20] sm:$0xff]  ;;  %24 = vst.msk [vmem:[#allocation2 + $0x8] sm:$0xf] %vm21_vm0, %v1796_v2  ;;  %1777 = vset.pattern.permute.xlu1 %v1796_v2  ;;  %1776 = vset.pattern.permute.xlu0 %v1796_v2  ;;  %v1865_v7 = vld [vmem:[%s2754_s0 + $0x38] sm:$0xff]  ;;  %s1800_s11 = smov 122  }
   0x2   :  { %v69_v3 = vpack.c.bf16 %v1838_v0, %v1838_v0  ;;  %v67_v4 = vpack.c.bf16 %v1843_v1, %v1843_v1  ;;  %33 = vst.msk [vmem:[#allocation2 + $0x8] sm:$0xf] %vm30_vm1, %v1796_v2  ;;  %1775 = vset.pattern.permute.xlu2 %v1796_v2  ;;  %v1854_v5 = vld [vmem:[%s2754_s0 + $0x10] sm:$0xff]  ;;  %v1870_v8 = vld [vmem:[%s2754_s0 + $0x28] sm:$0xff]  ;;  %v1878_v9 = vld [vmem:[%s2754_s0 + $0x18] sm:$0xff]  ;;  %v70_v10 = vpack.c.bf16 %v1865_v7, %v1865_v7  ;;  %s1801_s12 = smov 127  }
   0x3   :  { %22 = vst.msk [vmem:[#allocation2] sm:$0xf] %vm21_vm0, %v1796_v2  ;;  %v65_v6 = vpack.c.bf16 %v1854_v5, %v1854_v5  ;;  %v68_v11 = vpack.c.bf16 %v1870_v8, %v1870_v8  ;;  %v66_v12 = vpack.c.bf16 %v1878_v9, %v1878_v9  ;;  %v1897_v13 = vld [vmem:[%s2754_s0 + $0x8] sm:$0xff]  ;;  %v1902_v14 = vld [vmem:[%s2754_s0] sm:$0xff]  ;;  %s1798_s0 = smov 125   ;;  %s1802_s13 = smov 123  }
   0x4   :  { %91 = vrot.lane.b32.xlu0 %v69_v3, %s1797_s24  ;;  %87 = vrot.lane.b32.xlu1 %v67_v4, %s1797_s24  ;;  %23 = vst.msk [vmem:[#allocation2 + $0x4] sm:$0xf] %vm21_vm0, %v1796_v2  ;;  %v64_v15 = vpack.c.bf16 %v1897_v13, %v1897_v13  ;;  %v63_v16 = vpack.c.bf16 %v1902_v14, %v1902_v14  ;;  %s1803_s14 = smov 124   ;;  %v45_v46 = vld [vmem:[%s2755_s2 + $0x10] sm:$0xff]  ;;  %v1746_v47 = vld [vmem:[%s2756_s1 + $0x4] sm:$0xf] }
   0x5   :  { %25 = vst.msk [vmem:[#allocation2 + $0xc] sm:$0xf] %vm21_vm0, %v1796_v2  ;;  %83 = vrot.lane.b32.xlu2 %v65_v6, %s1797_s24  ;;  %v1662_v48 = vld [vmem:[%s2756_s1 + $0x8] sm:$0xf0]  ;;  %v1660_v50 = vld [vmem:[%s2756_s1] sm:$0xf] }
   0x6   :  { %26 = vst.msk [vmem:[#allocation2 + $0x10] sm:$0xf] %vm21_vm0, %v1796_v2  ;;  %v1747_v51 = vld [vmem:[%s2756_s1 + $0x4] sm:$0xf0]  ;;  %v1995_v52 = vor.u32 %v1746_v47, %v1662_v48  ;;  %vm182_vm3 = vcmask 785408   ;;  %v49_v59 = vld [vmem:[%s2757_s3 + $0x10] sm:$0xff] }
   0x7   :  { %27 = vst.msk [vmem:[#allocation2 + $0x14] sm:$0xf] %vm21_vm0, %v1796_v2  ;;  %v1997_v55 = vor.u32 %v1747_v51, %v1660_v50  ;;  %v44_v58 = vld [vmem:[%s2755_s2 + $0x8] sm:$0xff]  ;;  %v43_v60 = vld [vmem:[%s2755_s2] sm:$0xff]  ;;  %v1748_v61 = vld [vmem:[%s2756_s1 + $0x14] sm:$0xf] }
   0x8   :  { %28 = vst.msk [vmem:[#allocation2 + $0x18] sm:$0xf] %vm21_vm0, %v1796_v2  ;;  %v1670_v62 = vld [vmem:[%s2756_s1 + $0x18] sm:$0xf0]  ;;  %v1668_v63 = vld [vmem:[%s2756_s1 + $0x10] sm:$0xf] }
   0x9   :  { %29 = vst.msk [vmem:[#allocation2 + $0x1c] sm:$0xf] %vm21_vm0, %v1796_v2  ;;  %v2025_v3 = vor.u32 %v1748_v61, %v1670_v62  ;;  %v53_v4 = vld [vmem:[%s2758_s4 + $0x10] sm:$0xff]  ;;  %vm362_vm4 = vcmask 130048  }
   0xa   :  { %37 = vst.msk [vmem:[#allocation2 + $0x18] sm:$0xf] %vm30_vm1, %v1796_v2 }
   0xb   :  { %31 = vst.msk [vmem:[#allocation2] sm:$0xf] %vm30_vm1, %v1796_v2 }
   0xc   :  { %93 = vrot.lane.b32.xlu0 %v70_v10, %s1797_s24  ;;  %89 = vrot.lane.b32.xlu1 %v68_v11, %s1797_s24  ;;  %32 = vst.msk [vmem:[#allocation2 + $0x4] sm:$0xf] %vm30_vm1, %v1796_v2  ;;  %v54_v10 = vld [vmem:[%s2758_s4 + $0x18] sm:$0xff] }
   0xd   :  { %34 = vst.msk [vmem:[#allocation2 + $0xc] sm:$0xf] %vm30_vm1, %v1796_v2  ;;  %85 = vrot.lane.b32.xlu2 %v66_v12, %s1797_s24  ;;  %v46_v11 = vld [vmem:[%s2755_s2 + $0x18] sm:$0xff] }
   0xe   :  { %35 = vst.msk [vmem:[#allocation2 + $0x10] sm:$0xf] %vm30_vm1, %v1796_v2 }
   0xf   :  { %36 = vst.msk [vmem:[#allocation2 + $0x14] sm:$0xf] %vm30_vm1, %v1796_v2 }
  0x10   :  { %38 = vst.msk [vmem:[#allocation2 + $0x1c] sm:$0xf] %vm30_vm1, %v1796_v2  ;;  %v1749_v2 = vld [vmem:[%s2756_s1 + $0x14] sm:$0xf0] }
  0x11   :  { %v2037_v12 = vor.u32 %v1749_v2, %v1668_v63 }
  0x14   :  { %81 = vrot.lane.b32.xlu1 %v64_v15, %s1797_s24  ;;  %79 = vrot.lane.b32.xlu0 %v63_v16, %s1797_s24  ;;  %v48_v16 = vld [vmem:[%s2757_s3 + $0x8] sm:$0xff] }
  0x5f   :  { %v84_v17 = vpop.permute.xlu2 %83 }
  0x60   :  { %106 = vst.msk [vmem:[#allocation2 + $0x8] sm:$0xf] %vm103_vm2, %v84_v17  ;;  %v51_v17 = vld [vmem:[%s2758_s4] sm:$0xff] }
  0x67   :  { %v86_v18 = vpop.permute.xlu2 %85 }
  0x68   :  { %107 = vst.msk [vmem:[#allocation2 + $0xc] sm:$0xf] %vm103_vm2, %v86_v18  ;;  %v50_v18 = vld [vmem:[%s2757_s3 + $0x18] sm:$0xff] }
  0x6f   :  { %v1917_v19 = vld [vmem:[#allocation2 + $0x8] sm:$0xff] }
  0x70   :  { %142 = vrot.lane.b32.xlu1 %v1917_v19, %s1798_s0 }
  0x76   :  { %v92_v20 = vpop.permute.xlu0 %91  ;;  %v88_v21 = vpop.permute.xlu1 %87 }
  0x77   :  { %110 = vst.msk [vmem:[#allocation2 + $0x18] sm:$0xf] %vm103_vm2, %v92_v20  ;;  %v52_v20 = vld [vmem:[%s2758_s4 + $0x8] sm:$0xff] }
  0x78   :  { %108 = vst.msk [vmem:[#allocation2 + $0x10] sm:$0xf] %vm103_vm2, %v88_v21 }
  0x7e   :  { %v94_v22 = vpop.permute.xlu0 %93  ;;  %v90_v23 = vpop.permute.xlu1 %89 }
  0x7f   :  { %111 = vst.msk [vmem:[#allocation2 + $0x1c] sm:$0xf] %vm103_vm2, %v94_v22 }
  0x80   :  { %109 = vst.msk [vmem:[#allocation2 + $0x14] sm:$0xf] %vm103_vm2, %v90_v23 }
  0x86   :  { %v82_v24 = vpop.permute.xlu1 %81  ;;  %v80_v25 = vpop.permute.xlu0 %79  ;;  %v1925_v26 = vld [vmem:[#allocation2 + $0x18] sm:$0xff] }
  0x87   :  { %105 = vst.msk [vmem:[#allocation2 + $0x4] sm:$0xf] %vm103_vm2, %v82_v24  ;;  %v1928_v27 = vld [vmem:[#allocation2 + $0x10] sm:$0xff]  ;;  %258 = vrot.lane.b32.xlu2 %v1925_v26, %s1798_s0 }
  0x88   :  { %104 = vst.msk [vmem:[#allocation2] sm:$0xf] %vm103_vm2, %v80_v25  ;;  %256 = vrot.lane.b32.xlu0 %v1928_v27, %s1798_s0 }
  0x8f   :  { %v1935_v28 = vld [vmem:[#allocation2] sm:$0xff]  ;;  %252 = vrot.lane.b32.xlu2 %v1925_v26, %s1799_s10 }
  0x90   :  { %276 = vrot.lane.b32.xlu0 %v1925_v26, %s1800_s11  ;;  %140 = vrot.lane.b32.xlu1 %v1935_v28, %s1798_s0 }
  0x97   :  { %250 = vrot.lane.b32.xlu2 %v1928_v27, %s1799_s10 }
  0x98   :  { %274 = vrot.lane.b32.xlu0 %v1928_v27, %s1800_s11  ;;  %136 = vrot.lane.b32.xlu1 %v1917_v19, %s1799_s10 }
  0x9f   :  { %160 = vrot.lane.b32.xlu2 %v1917_v19, %s1800_s11 }
  0xa0   :  { %246 = vrot.lane.b32.xlu0 %v1925_v26, %s1801_s12  ;;  %270 = vrot.lane.b32.xlu1 %v1925_v26, %s1802_s13 }
  0xa7   :  { %134 = vrot.lane.b32.xlu2 %v1935_v28, %s1799_s10 }
  0xa8   :  { %158 = vrot.lane.b32.xlu0 %v1935_v28, %s1800_s11  ;;  %244 = vrot.lane.b32.xlu1 %v1928_v27, %s1801_s12 }
  0xaf   :  { %268 = vrot.lane.b32.xlu2 %v1928_v27, %s1802_s13 }
  0xb0   :  { %130 = vrot.lane.b32.xlu0 %v1917_v19, %s1801_s12  ;;  %154 = vrot.lane.b32.xlu1 %v1917_v19, %s1802_s13 }
  0xb7   :  { %264 = vrot.lane.b32.xlu2 %v1925_v26, %s1803_s14 }
  0xb8   :  { %128 = vrot.lane.b32.xlu0 %v1935_v28, %s1801_s12  ;;  %152 = vrot.lane.b32.xlu1 %v1935_v28, %s1802_s13 }
  0xbf   :  { %262 = vrot.lane.b32.xlu2 %v1928_v27, %s1803_s14 }
  0xc0   :  { %148 = vrot.lane.b32.xlu0 %v1917_v19, %s1803_s14  ;;  %146 = vrot.lane.b32.xlu1 %v1935_v28, %s1803_s14 }
  0xc7   :  { %320 = vperm.xlu2 %1775, %v43_v60  }
  0xc8   :  { %330 = vperm.xlu1 %1777, %v45_v46   ;;  %325 = vperm.xlu0 %1776, %v44_v58  }
  0xcf   :  { %335 = vperm.xlu2 %1775, %v46_v11  }
  0xd0   :  { %484 = vperm.xlu1 %1777, %v49_v59   ;;  %512 = vperm.xlu0 %1776, %v53_v4  }
  0xd7   :  { %489 = vperm.xlu2 %1775, %v50_v18  }
  0xd8   :  { %517 = vperm.xlu1 %1777, %v54_v10   ;;  %479 = vperm.xlu0 %1776, %v48_v16  }
  0xe0   :  { %502 = vperm.xlu1 %1777, %v51_v17  }
  0xe1   :  { %v259_v29 = vpop.permute.xlu2 %258 }
  0xe2   :  { %280 = vmatpush.bf16.msra.mxu2 %v259_v29  ;;  %v143_v30 = vpop.permute.xlu1 %142 }
  0xe3   :  { %189 = vmatpush.bf16.msra.mxu0 %v143_v30 }
  0xe9   :  { %v253_v31 = vpop.permute.xlu2 %252 }
  0xf1   :  { %v251_v32 = vpop.permute.xlu2 %250 }
  0xf9   :  { %v161_v33 = vpop.permute.xlu2 %160 }
  0xfa   :  { %v257_v34 = vpop.permute.xlu0 %256  ;;  %210 = vmatpush.bf16.msra.mxu1 %v161_v33 }
  0xfb   :  { %281 = vmatpush.bf16.msra.mxu2 %v257_v34 }
  0xff   :  { %282 = vmatpush.bf16.msra.mxu2 %v253_v31 }
 0x101   :  { %v135_v35 = vpop.permute.xlu2 %134 }
 0x102   :  { %v141_v36 = vpop.permute.xlu1 %140  ;;  %v277_v37 = vpop.permute.xlu0 %276 }
 0x103   :  { %283 = vmatpush.bf16.msra.mxu2 %v251_v32  ;;  %301 = vmatpush.bf16.msra.mxu3 %v277_v37 }
 0x104   :  { %190 = vmatpush.bf16.msra.mxu0 %v141_v36 }
 0x109   :  { %v269_v40 = vpop.permute.xlu2 %268 }
 0x10a   :  { %v137_v38 = vpop.permute.xlu1 %136  ;;  %v275_v39 = vpop.permute.xlu0 %274 }
 0x10b   :  { %191 = vmatpush.bf16.msra.mxu0 %v137_v38  ;;  %302 = vmatpush.bf16.msra.mxu3 %v275_v39 }
 0x10f   :  { %192 = vmatpush.bf16.msra.mxu0 %v135_v35 }
 0x111   :  { %v265_v43 = vpop.permute.xlu2 %264 }
 0x112   :  { %v271_v41 = vpop.permute.xlu1 %270  ;;  %v247_v42 = vpop.permute.xlu0 %246 }
 0x113   :  { %284 = vmatpush.bf16.msra.mxu2 %v247_v42  ;;  %303 = vmatpush.bf16.msra.mxu3 %v271_v41 }
 0x117   :  { %304 = vmatpush.bf16.msra.mxu3 %v269_v40 }
 0x119   :  { %v263_v49 = vpop.permute.xlu2 %262 }
 0x11a   :  { %v245_v44 = vpop.permute.xlu1 %244  ;;  %v159_v45 = vpop.permute.xlu0 %158 }
 0x11b   :  { %211 = vmatpush.bf16.msra.mxu1 %v159_v45  ;;  %285 = vmatpush.bf16.msra.mxu2 %v245_v44 }
 0x11c   :  { %305 = vmatpush.bf16.msra.mxu3 %v265_v43  ;;  %v1804_v43 = vmov 32.0  }
 0x11d   :  { %1778 = vrcp.f32 %v1804_v43 }
 0x11f   :  { %286 = vmatpush.bf16.msra.mxu2 %v1925_v26 }
 0x120   :  { %306 = vmatpush.bf16.msra.mxu3 %v263_v49 }
 0x122   :  { %v155_v53 = vpop.permute.xlu1 %154  ;;  %v131_v54 = vpop.permute.xlu0 %130 }
 0x123   :  { %193 = vmatpush.bf16.msra.mxu0 %v131_v54  ;;  %212 = vmatpush.bf16.msra.mxu1 %v155_v53  ;;  %v1779_v53 = vpop.eup %1778 }
 0x124   :  { %287 = vmatpush.bf16.msra.mxu2 %v1928_v27  ;;  %1684 = vmatmul.msk.bf16.vlgmr.msra.gmra.mxu3 %vm182_vm3, %v1995_v52  ;;  %vm394_vm5 = vweird.f32 %v1779_v53 }
 0x127   :  { %288 = vmatmul.bf16.vlgmr.msra.gmra.mxu2 %v1997_v55 }
 0x12a   :  { %v153_v56 = vpop.permute.xlu1 %152  ;;  %v129_v57 = vpop.permute.xlu0 %128 }
 0x12b   :  { %194 = vmatpush.bf16.msra.mxu0 %v129_v57  ;;  %213 = vmatpush.bf16.msra.mxu1 %v153_v56 }
 0x12f   :  { %195 = vmatpush.bf16.msra.mxu0 %v1917_v19  ;;  %v47_v19 = vld [vmem:[%s2757_s3] sm:$0xff] }
 0x130   :  { %474 = vperm.xlu2 %1775, %v47_v19  }
 0x132   :  { %v149_v6 = vpop.permute.xlu0 %148  ;;  %v147_v15 = vpop.permute.xlu1 %146 }
 0x133   :  { %196 = vmatpush.bf16.msra.mxu0 %v1935_v28  ;;  %214 = vmatpush.bf16.msra.mxu1 %v149_v6  ;;  %v2063_v28 = vpop.permute.xlu2 %320 }
 0x134   :  { %1685 = vmatmul.msk.bf16.gmra.mxu3 %vm182_vm3, %v2025_v3 }
 0x136   :  { %197 = vmatmul.bf16.vlgmr.msra.gmra.mxu0 %v1997_v55 }
 0x137   :  { %293 = vmatmul.bf16.gmra.mxu2 %v2037_v12  ;;  %215 = vmatpush.bf16.msra.mxu1 %v147_v15 }
 0x138   :  { %507 = vperm.xlu2 %1775, %v52_v20  }
 0x13a   :  { %1674 = vmatmul.msk.bf16.vlgmr.msra.gmra.mxu1 %vm182_vm3, %v1995_v52  ;;  %v2065_v29 = vpop.permute.xlu0 %325  ;;  %v2069_v39 = vpop.permute.xlu1 %330 }
 0x146   :  { %202 = vmatmul.bf16.gmra.mxu0 %v2037_v12 }
 0x14a   :  { %1675 = vmatmul.msk.bf16.gmra.mxu1 %vm182_vm3, %v2025_v3 }
 0x1a7   :  { %v308_v21 = vpop.f32.mrf.mxu3 }
 0x1aa   :  { %v289_v22 = vpop.f32.mrf.mxu2 }
 0x1ab   :  { %v309_v24 = vadd.f32 %v308_v21, %v289_v22 }
 0x1ad   :  { %v342_v30 = vadd.f32 %v2063_v28, %v309_v24 }
 0x1af   :  { %v310_v23 = vpop.f32.mrf.mxu3  ;;  %v350_v34 = vmax.f32 %v342_v30, 0.0 }
 0x1b1   :  { %v2072_v40 = vadd.f32 %v350_v34, %v1843_v1 }
 0x1b2   :  { %v291_v25 = vpop.f32.mrf.mxu2 }
 0x1b3   :  { %v311_v26 = vadd.f32 %v310_v23, %v291_v25  ;;  %v198_v27 = vpop.f32.mrf.mxu0  ;;  %v376_v47 = vsel %vm362_vm4, %v2072_v40, 0.0 }
 0x1b5   :  { %v343_v31 = vadd.f32 %v2065_v29, %v311_v26 }
 0x1b7   :  { %v217_v32 = vpop.f32.mrf.mxu1  ;;  %v313_v33 = vpop.f32.mrf.mxu3  ;;  %v351_v35 = vmax.f32 %v343_v31, 0.0 }
 0x1b8   :  { %v218_v54 = vadd.f32 %v217_v32, %v198_v27 }
 0x1b9   :  { %v2076_v42 = vadd.f32 %v351_v35, %v1870_v8  ;;  %v2083_v8 = vpop.permute.xlu2 %335 }
 0x1ba   :  { %v294_v36 = vpop.f32.mrf.mxu2  ;;  %v338_v63 = vadd.f32 %v2063_v28, %v218_v54 }
 0x1bb   :  { %v314_v37 = vadd.f32 %v313_v33, %v294_v36  ;;  %v200_v38 = vpop.f32.mrf.mxu0  ;;  %v377_v1 = vsel %vm362_vm4, %v2076_v42, 0.0 }
 0x1bc   :  { %v378_v56 = vadd.f32 %v377_v1, %v376_v47  ;;  %v346_v17 = vmax.f32 %v338_v63, 0.0 }
 0x1bd   :  { %v344_v41 = vadd.f32 %v2069_v39, %v314_v37 }
 0x1be   :  { %v354_v25 = vadd.f32 %v346_v17, %v1902_v14 }
 0x1bf   :  { %v352_v44 = vmax.f32 %v344_v41, 0.0  ;;  %v219_v45 = vpop.f32.mrf.mxu1  ;;  %v315_v46 = vpop.f32.mrf.mxu3 }
 0x1c0   :  { %v220_v49 = vadd.f32 %v219_v45, %v200_v38  ;;  %v363_v34 = vsel %vm362_vm4, %v354_v25, 0.0 }
 0x1c1   :  { %v360_v48 = vadd.f32 %v352_v44, %v1838_v0  ;;  %v390_v0 = vmul.f32 32.0, %v1779_v53 }
 0x1c2   :  { %v296_v50 = vpop.f32.mrf.mxu2  ;;  %v339_v60 = vadd.f32 %v2065_v29, %v220_v49 }
 0x1c3   :  { %v316_v51 = vadd.f32 %v315_v46, %v296_v50  ;;  %v379_v57 = vsel %vm362_vm4, %v360_v48, 0.0  ;;  %v203_v59 = vpop.f32.mrf.mxu0  ;;  %v391_v16 = vsub.f32 1.0, %v390_v0 }
 0x1c4   :  { %v380_v2 = vadd.f32 %v379_v57, %v378_v56  ;;  %v347_v10 = vmax.f32 %v339_v60, 0.0 }
 0x1c5   :  { %v345_v58 = vadd.f32 %v2083_v8, %v316_v51  ;;  %v392_v22 = vmul.f32 %v1779_v53, %v391_v16 }
 0x1c6   :  { %v355_v20 = vadd.f32 %v347_v10, %v1897_v13 }
 0x1c7   :  { %v353_v61 = vmax.f32 %v345_v58, 0.0  ;;  %v222_v62 = vpop.f32.mrf.mxu1  ;;  %v393_v33 = vadd.f32 %v1779_v53, %v392_v22 }
 0x1c8   :  { %v223_v4 = vadd.f32 %v222_v62, %v203_v59  ;;  %v364_v30 = vsel %vm362_vm4, %v355_v20, 0.0 }
 0x1c9   :  { %v361_v6 = vadd.f32 %v353_v61, %v1865_v7  ;;  %v365_v37 = vadd.f32 %v364_v30, %v363_v34  ;;  %v2100_v41 = vsel %vm394_vm5, %v1779_v53, %v393_v33 }
 0x1ca   :  { %v340_v11 = vadd.f32 %v2069_v39, %v223_v4 }
 0x1cb   :  { %v381_v15 = vsel %vm362_vm4, %v361_v6, 0.0  ;;  %v205_v23 = vpop.f32.mrf.mxu0 }
 0x1cc   :  { %v382_v18 = vadd.f32 %v381_v15, %v380_v2  ;;  %v348_v19 = vmax.f32 %v340_v11, 0.0 }
 0x1ce   :  { %v383_v21 = vrot.slane %v382_v18, 4  ;;  %v356_v7 = vadd.f32 %v348_v19, %v1854_v5 }
 0x1cf   :  { %v224_v24 = vpop.f32.mrf.mxu1 }
 0x1d0   :  { %v384_v26 = vadd.f32 %v383_v21, %v382_v18  ;;  %v225_v27 = vadd.f32 %v224_v24, %v205_v23  ;;  %v366_v35 = vsel %vm362_vm4, %v356_v7, 0.0 }
 0x1d1   :  { %v367_v5 = vadd.f32 %v366_v35, %v365_v37 }
 0x1d2   :  { %v385_v31 = vrot.slane %v384_v26, 2  ;;  %v341_v32 = vadd.f32 %v2083_v8, %v225_v27 }
 0x1d4   :  { %v386_v13 = vadd.f32 %v385_v31, %v384_v26  ;;  %v349_v36 = vmax.f32 %v341_v32, 0.0 }
 0x1d6   :  { %v387_v38 = vrot.slane %v386_v13, 1  ;;  %v357_v14 = vadd.f32 %v349_v36, %v1878_v9 }
 0x1d8   :  { %v388_v43 = vadd.f32 %v387_v38, %v386_v13  ;;  %v368_v44 = vsel %vm362_vm4, %v357_v14, 0.0 }
 0x1d9   :  { %v369_v45 = vadd.f32 %v368_v44, %v367_v5 }
 0x1da   :  { %v397_v46 = vmul.f32 %v2100_v41, %v388_v43 }
 0x1db   :  { %v370_v47 = vrot.slane %v369_v45, 4 }
 0x1dc   :  { %v2105_v1 = vsub.f32 %v2072_v40, %v397_v46  ;;  %v2108_v49 = vsub.f32 %v2076_v42, %v397_v46  ;;  %v2110_v50 = vsub.f32 %v360_v48, %v397_v46  ;;  %v2112_v51 = vsub.f32 %v361_v6, %v397_v46 }
 0x1dd   :  { %v371_v9 = vadd.f32 %v370_v47, %v369_v45 }
 0x1de   :  { %v410_v53 = vmul.f32 %v2105_v1, %v2105_v1  ;;  %v411_v54 = vmul.f32 %v2108_v49, %v2108_v49  ;;  %v412_v56 = vmul.f32 %v2110_v50, %v2110_v50  ;;  %v413_v40 = vmul.f32 %v2112_v51, %v2112_v51 }
 0x1df   :  { %v372_v57 = vrot.slane %v371_v9, 2 }
 0x1e0   :  { %v427_v42 = vsel %vm362_vm4, %v410_v53, 0.0  ;;  %v428_v48 = vsel %vm362_vm4, %v411_v54, 0.0  ;;  %v430_v60 = vsel %vm362_vm4, %v412_v56, 0.0  ;;  %v432_v62 = vsel %vm362_vm4, %v413_v40, 0.0  ;;  %v2137_v54 = vpop.permute.xlu2 %489 }
 0x1e1   :  { %v429_v58 = vadd.f32 %v428_v48, %v427_v42  ;;  %v373_v59 = vadd.f32 %v372_v57, %v371_v9  ;;  %v2140_v48 = vpop.permute.xlu1 %484 }
 0x1e3   :  { %v431_v61 = vadd.f32 %v430_v60, %v429_v58  ;;  %v374_v0 = vrot.slane %v373_v59, 1  ;;  %v2143_v60 = vpop.permute.xlu0 %512 }
 0x1e5   :  { %v433_v63 = vadd.f32 %v432_v62, %v431_v61  ;;  %v375_v2 = vadd.f32 %v374_v0, %v373_v59 }
 0x1e7   :  { %v434_v4 = vrot.slane %v433_v63, 4  ;;  %v396_v6 = vmul.f32 %v2100_v41, %v375_v2 }
 0x1e8   :  { %v2148_v62 = vpop.permute.xlu2 %474 }
 0x1e9   :  { %v435_v10 = vadd.f32 %v434_v4, %v433_v63  ;;  %v2127_v11 = vsub.f32 %v354_v25, %v396_v6  ;;  %v399_v15 = vsub.f32 %v355_v20, %v396_v6  ;;  %v400_v16 = vsub.f32 %v356_v7, %v396_v6 }
 0x1ea   :  { %v401_v17 = vsub.f32 %v357_v14, %v396_v6  ;;  %v2153_v6 = vpop.permute.xlu1 %517 }
 0x1eb   :  { %v436_v18 = vrot.slane %v435_v10, 2  ;;  %v406_v19 = vmul.f32 %v2127_v11, %v2127_v11  ;;  %v407_v21 = vmul.f32 %v399_v15, %v399_v15  ;;  %v408_v22 = vmul.f32 %v400_v16, %v400_v16 }
 0x1ec   :  { %v409_v24 = vmul.f32 %v401_v17, %v401_v17 }
 0x1ed   :  { %v437_v23 = vadd.f32 %v436_v18, %v435_v10  ;;  %v414_v26 = vsel %vm362_vm4, %v406_v19, 0.0  ;;  %v415_v27 = vsel %vm362_vm4, %v407_v21, 0.0  ;;  %v417_v25 = vsel %vm362_vm4, %v408_v22, 0.0 }
 0x1ee   :  { %v416_v30 = vadd.f32 %v415_v27, %v414_v26  ;;  %v419_v7 = vsel %vm362_vm4, %v409_v24, 0.0 }
 0x1ef   :  { %v438_v31 = vrot.slane %v437_v23, 1 }
 0x1f0   :  { %v418_v32 = vadd.f32 %v417_v25, %v416_v30 }
 0x1f1   :  { %v439_v20 = vadd.f32 %v438_v31, %v437_v23  ;;  %v2156_v23 = vpop.permute.xlu0 %479  ;;  %v2162_v31 = vpop.permute.xlu2 %507 }
 0x1f2   :  { %v420_v33 = vadd.f32 %v419_v7, %v418_v32  ;;  %v2183_v7 = vpop.permute.xlu1 %502 }
 0x1f3   :  { %v441_v34 = vmul.f32 %v439_v20, %v2100_v41 }
 0x1f4   :  { %v421_v13 = vrot.slane %v420_v33, 4 }
 0x1f5   :  { %v443_v35 = vadd.f32 1e-05, %v441_v34 }
 0x1f6   :  { %v422_v36 = vadd.f32 %v421_v13, %v420_v33 }
 0x1f7   :  { %1780 = vrsqrt.f32 %v443_v35  ;;  %vm460_vm7 = vweird.f32 %v443_v35 }
 0x1f8   :  { %v423_v37 = vrot.slane %v422_v36, 2 }
 0x1fa   :  { %v424_v38 = vadd.f32 %v423_v37, %v422_v36 }
 0x1fc   :  { %v425_v14 = vrot.slane %v424_v38, 1 }
 0x1fd   :  { %v1781_v5 = vpop.eup %1780 }
 0x1fe   :  { %v455_v43 = vmul.f32 %v1781_v5, %v443_v35  ;;  %v426_v44 = vadd.f32 %v425_v14, %v424_v38  ;;  %vm461_vm6 = vweird.f32 %v1781_v5 }
 0x1ff   :  { %vm462_vm8 = vmor %vm460_vm7, %vm461_vm6 }
 0x200   :  { %v456_v45 = vmul.f32 %v1781_v5, %v455_v43  ;;  %v440_v46 = vmul.f32 %v426_v44, %v2100_v41 }
 0x202   :  { %v457_v47 = vmul.f32 0.5, %v456_v45  ;;  %v442_v9 = vadd.f32 1e-05, %v440_v46 }
 0x204   :  { %v458_v53 = vsub.f32 1.5, %v457_v47  ;;  %1782 = vrsqrt.f32 %v442_v9  ;;  %vm450_vm10 = vweird.f32 %v442_v9 }
 0x206   :  { %v459_v56 = vmul.f32 %v1781_v5, %v458_v53 }
 0x208   :  { %v463_v57 = vsel %vm462_vm8, %v1781_v5, %v459_v56 }
 0x209   :  { %v470_v40 = vmul.f32 %v463_v57, %v2110_v50  ;;  %v471_v22 = vmul.f32 %v463_v57, %v2112_v51  ;;  %v468_v13 = vmul.f32 %v463_v57, %v2105_v1  ;;  %v469_v35 = vmul.f32 %v463_v57, %v2108_v49 }
 0x20a   :  { %v1783_v42 = vpop.eup %1782 }
 0x20b   :  { %v445_v58 = vmul.f32 %v1783_v42, %v442_v9  ;;  %v498_v59 = vmul.f32 %v2140_v48, %v470_v40  ;;  %vm451_vm9 = vweird.f32 %v1783_v42  ;;  %v496_v38 = vmul.f32 %v2148_v62, %v468_v13 }
 0x20c   :  { %vm452_vm11 = vmor %vm450_vm10, %vm451_vm9  ;;  %v497_v14 = vmul.f32 %v2156_v23, %v469_v35 }
 0x20d   :  { %v446_v61 = vmul.f32 %v1783_v42, %v445_v58  ;;  %v2146_v0 = vadd.f32 %v2143_v60, %v498_v59  ;;  %v2203_v5 = vadd.f32 %v2183_v7, %v496_v38 }
 0x20e   :  { %v2206_v1 = vadd.f32 %v2162_v31, %v497_v14 }
 0x20f   :  { %v447_v63 = vmul.f32 0.5, %v446_v61  ;;  %v534_v2 = vpack.c.bf16 %v2146_v0, %v2146_v0  ;;  %v532_v49 = vpack.c.bf16 %v2203_v5, %v2203_v5 }
 0x210   :  { %v533_v43 = vpack.c.bf16 %v2206_v1, %v2206_v1 }
 0x211   :  { %v448_v4 = vsub.f32 1.5, %v447_v63  ;;  %556 = vrot.lane.b32.xlu2 %v534_v2, %s1797_s24 }
 0x213   :  { %v449_v50 = vmul.f32 %v1783_v42, %v448_v4 }
 0x215   :  { %v453_v10 = vsel %vm452_vm11, %v1783_v42, %v449_v50 }
 0x216   :  { %v467_v18 = vmul.f32 %v453_v10, %v401_v17  ;;  %v466_v19 = vmul.f32 %v453_v10, %v400_v16  ;;  %v465_v21 = vmul.f32 %v453_v10, %v399_v15  ;;  %v464_v30 = vmul.f32 %v453_v10, %v2127_v11 }
 0x217   :  { %v499_v15 = vmul.f32 %v2137_v54, %v471_v22 }
 0x218   :  { %v495_v24 = vmul.f32 %v2137_v54, %v467_v18  ;;  %v494_v26 = vmul.f32 %v2140_v48, %v466_v19  ;;  %v493_v27 = vmul.f32 %v2156_v23, %v465_v21  ;;  %v492_v20 = vmul.f32 %v2148_v62, %v464_v30 }
 0x219   :  { %v2190_v34 = vadd.f32 %v2153_v6, %v499_v15 }
 0x21a   :  { %v2165_v25 = vadd.f32 %v2153_v6, %v495_v24  ;;  %v2168_v16 = vadd.f32 %v2143_v60, %v494_v26  ;;  %v2171_v51 = vadd.f32 %v2162_v31, %v493_v27  ;;  %v2187_v33 = vadd.f32 %v2183_v7, %v492_v20 }
 0x21b   :  { %v535_v37 = vpack.c.bf16 %v2190_v34, %v2190_v34 }
 0x21c   :  { %v531_v17 = vpack.c.bf16 %v2165_v25, %v2165_v25  ;;  %v530_v32 = vpack.c.bf16 %v2168_v16, %v2168_v16  ;;  %v529_v11 = vpack.c.bf16 %v2171_v51, %v2171_v51  ;;  %v528_v36 = vpack.c.bf16 %v2187_v33, %v2187_v33 }
 0x21e   :  { %550 = vrot.lane.b32.xlu1 %v531_v17, %s1797_s24  ;;  %548 = vrot.lane.b32.xlu0 %v530_v32, %s1797_s24 }
 0x21f   :  { %546 = vrot.lane.b32.xlu2 %v529_v11, %s1797_s24 }
 0x226   :  { %544 = vrot.lane.b32.xlu1 %v528_v36, %s1797_s24  ;;  %558 = vrot.lane.b32.xlu0 %v535_v37, %s1797_s24 }
 0x22e   :  { %552 = vrot.lane.b32.xlu0 %v532_v49, %s1797_s24  ;;  %554 = vrot.lane.b32.xlu1 %v533_v43, %s1797_s24 }
 0x26b   :  { %v557_v44 = vpop.permute.xlu2 %556 }
 0x26c   :  { %574 = vst.msk [vmem:[#allocation2 + $0x18] sm:$0xf] %vm103_vm2, %v557_v44 }
 0x279   :  { %v547_v45 = vpop.permute.xlu2 %546 }
 0x27a   :  { %569 = vst.msk [vmem:[#allocation2 + $0x4] sm:$0xf] %vm103_vm2, %v547_v45 }
 0x290   :  { %v551_v46 = vpop.permute.xlu1 %550  ;;  %v549_v47 = vpop.permute.xlu0 %548 }
 0x291   :  { %571 = vst.msk [vmem:[#allocation2 + $0xc] sm:$0xf] %vm103_vm2, %v551_v46 }
 0x292   :  { %570 = vst.msk [vmem:[#allocation2 + $0x8] sm:$0xf] %vm103_vm2, %v549_v47 }
 0x298   :  { %v545_v9 = vpop.permute.xlu1 %544  ;;  %v559_v53 = vpop.permute.xlu0 %558 }
 0x299   :  { %568 = vst.msk [vmem:[#allocation2] sm:$0xf] %vm103_vm2, %v545_v9  ;;  %v1755_v56 = vld [vmem:[#allocation2 + $0x8] sm:$0xff] }
 0x29a   :  { %575 = vst.msk [vmem:[#allocation2 + $0x1c] sm:$0xf] %vm103_vm2, %v559_v53  ;;  %624 = vrot.lane.b32.xlu1 %v1755_v56, %s1800_s11  ;;  %606 = vrot.lane.b32.xlu2 %v1755_v56, %s1798_s0 }
 0x2a0   :  { %v555_v57 = vpop.permute.xlu1 %554  ;;  %v553_v40 = vpop.permute.xlu0 %552  ;;  %v1754_v42 = vld [vmem:[#allocation2] sm:$0xff] }
 0x2a1   :  { %573 = vst.msk [vmem:[#allocation2 + $0x14] sm:$0xf] %vm103_vm2, %v555_v57  ;;  %604 = vrot.lane.b32.xlu0 %v1754_v42, %s1798_s0  ;;  %v2233_v58 = vld [vmem:[#allocation2 + $0x18] sm:$0xff] }
 0x2a2   :  { %572 = vst.msk [vmem:[#allocation2 + $0x10] sm:$0xf] %vm103_vm2, %v553_v40  ;;  %600 = vrot.lane.b32.xlu1 %v1755_v56, %s1799_s10  ;;  %622 = vrot.lane.b32.xlu2 %v1754_v42, %s1800_s11 }
 0x2a9   :  { %618 = vrot.lane.b32.xlu0 %v1755_v56, %s1802_s13  ;;  %v2235_v59 = vld [vmem:[#allocation2 + $0x10] sm:$0xff] }
 0x2aa   :  { %616 = vrot.lane.b32.xlu1 %v1754_v42, %s1802_s13  ;;  %598 = vrot.lane.b32.xlu2 %v1754_v42, %s1799_s10 }
 0x2b1   :  { %594 = vrot.lane.b32.xlu0 %v1755_v56, %s1801_s12 }
 0x2b2   :  { %592 = vrot.lane.b32.xlu1 %v1754_v42, %s1801_s12  ;;  %612 = vrot.lane.b32.xlu2 %v1755_v56, %s1803_s14 }
 0x2b9   :  { %696 = vrot.lane.b32.xlu0 %v2233_v58, %s1798_s0 }
 0x2ba   :  { %714 = vrot.lane.b32.xlu2 %v2233_v58, %s1800_s11  ;;  %694 = vrot.lane.b32.xlu1 %v2235_v59, %s1798_s0 }
 0x2c1   :  { %712 = vrot.lane.b32.xlu0 %v2235_v59, %s1800_s11 }
 0x2c2   :  { %690 = vrot.lane.b32.xlu2 %v2233_v58, %s1799_s10  ;;  %708 = vrot.lane.b32.xlu1 %v2233_v58, %s1802_s13 }
 0x2c9   :  { %688 = vrot.lane.b32.xlu0 %v2235_v59, %s1799_s10 }
 0x2ca   :  { %706 = vrot.lane.b32.xlu2 %v2235_v59, %s1802_s13  ;;  %684 = vrot.lane.b32.xlu1 %v2233_v58, %s1801_s12 }
 0x2d1   :  { %702 = vrot.lane.b32.xlu0 %v2233_v58, %s1803_s14 }
 0x2d2   :  { %682 = vrot.lane.b32.xlu2 %v2235_v59, %s1801_s12  ;;  %700 = vrot.lane.b32.xlu1 %v2235_v59, %s1803_s14 }
 0x2d9   :  { %610 = vrot.lane.b32.xlu0 %v1754_v42, %s1803_s14 }
 0x2f4   :  { %v607_v61 = vpop.permute.xlu2 %606 }
 0x2f5   :  { %628 = vmatpush.bf16.msrb.mxu1 %v607_v61 }
 0x2fc   :  { %v623_v63 = vpop.permute.xlu2 %622 }
 0x304   :  { %v599_v2 = vpop.permute.xlu2 %598 }
 0x30c   :  { %v625_v4 = vpop.permute.xlu1 %624  ;;  %v613_v50 = vpop.permute.xlu2 %612 }
 0x30d   :  { %649 = vmatpush.bf16.msrb.mxu3 %v625_v4 }
 0x311   :  { %650 = vmatpush.bf16.msrb.mxu3 %v623_v63 }
 0x313   :  { %v605_v10 = vpop.permute.xlu0 %604 }
 0x314   :  { %v601_v18 = vpop.permute.xlu1 %600  ;;  %v715_v19 = vpop.permute.xlu2 %714  ;;  %629 = vmatpush.bf16.msrb.mxu1 %v605_v10 }
 0x315   :  { %739 = vmatpush.bf16.msrb.mxu2 %v715_v19 }
 0x318   :  { %630 = vmatpush.bf16.msrb.mxu1 %v601_v18 }
 0x31b   :  { %v619_v21 = vpop.permute.xlu0 %618 }
 0x31c   :  { %v617_v22 = vpop.permute.xlu1 %616  ;;  %631 = vmatpush.bf16.msrb.mxu1 %v599_v2  ;;  %651 = vmatpush.bf16.msrb.mxu3 %v619_v21  ;;  %v691_v15 = vpop.permute.xlu2 %690 }
 0x320   :  { %652 = vmatpush.bf16.msrb.mxu3 %v617_v22 }
 0x323   :  { %v595_v24 = vpop.permute.xlu0 %594 }
 0x324   :  { %v593_v26 = vpop.permute.xlu1 %592  ;;  %632 = vmatpush.bf16.msrb.mxu1 %v595_v24  ;;  %653 = vmatpush.bf16.msrb.mxu3 %v613_v50  ;;  %v707_v11 = vpop.permute.xlu2 %706 }
 0x328   :  { %633 = vmatpush.bf16.msrb.mxu1 %v593_v26 }
 0x32b   :  { %v697_v27 = vpop.permute.xlu0 %696 }
 0x32c   :  { %v695_v30 = vpop.permute.xlu1 %694  ;;  %634 = vmatpush.bf16.msrb.mxu1 %v1755_v56  ;;  %718 = vmatpush.bf16.msrb.mxu0 %v697_v27  ;;  %v683_v35 = vpop.permute.xlu2 %682 }
 0x330   :  { %635 = vmatpush.bf16.msrb.mxu1 %v1754_v42  ;;  %719 = vmatpush.bf16.msrb.mxu0 %v695_v30 }
 0x333   :  { %v713_v17 = vpop.permute.xlu0 %712  ;;  %636 = vmatmul.bf16.vlgmr.msrb.gmra.mxu1 %v1997_v55 }
 0x334   :  { %v709_v32 = vpop.permute.xlu1 %708  ;;  %720 = vmatpush.bf16.msrb.mxu0 %v691_v15  ;;  %740 = vmatpush.bf16.msrb.mxu2 %v713_v17 }
 0x338   :  { %741 = vmatpush.bf16.msrb.mxu2 %v709_v32 }
 0x33b   :  { %v689_v20 = vpop.permute.xlu0 %688 }
 0x33c   :  { %721 = vmatpush.bf16.msrb.mxu0 %v689_v20  ;;  %742 = vmatpush.bf16.msrb.mxu2 %v707_v11  ;;  %v685_v13 = vpop.permute.xlu1 %684 }
 0x340   :  { %722 = vmatpush.bf16.msrb.mxu0 %v685_v13 }
 0x343   :  { %v703_v36 = vpop.permute.xlu0 %702  ;;  %641 = vmatmul.bf16.gmra.mxu1 %v2037_v12 }
 0x344   :  { %723 = vmatpush.bf16.msrb.mxu0 %v683_v35  ;;  %743 = vmatpush.bf16.msrb.mxu2 %v703_v36  ;;  %v701_v37 = vpop.permute.xlu1 %700 }
 0x348   :  { %724 = vmatpush.bf16.msrb.mxu0 %v2233_v58  ;;  %744 = vmatpush.bf16.msrb.mxu2 %v701_v37 }
 0x34b   :  { %1704 = vmatmul.msk.bf16.vlgmr.msrb.gmra.mxu2 %vm182_vm3, %v1995_v52  ;;  %v611_v38 = vpop.permute.xlu0 %610 }
 0x34c   :  { %654 = vmatpush.bf16.msrb.mxu3 %v611_v38  ;;  %725 = vmatpush.bf16.msrb.mxu0 %v2235_v59 }
 0x34f   :  { %1694 = vmatmul.msk.bf16.vlgmr.msrb.gmra.mxu3 %vm182_vm3, %v1995_v52  ;;  %726 = vmatmul.bf16.vlgmr.msrb.gmra.mxu0 %v1997_v55 }
 0x35b   :  { %1705 = vmatmul.msk.bf16.gmra.mxu2 %vm182_vm3, %v2025_v3 }
 0x35f   :  { %1695 = vmatmul.msk.bf16.gmra.mxu3 %vm182_vm3, %v2025_v3  ;;  %731 = vmatmul.bf16.gmra.mxu0 %v2037_v12 }
 0x3b0   :  { %v637_v14 = vpop.f32.mrf.mxu1 }
 0x3b8   :  { %v639_v46 = vpop.f32.mrf.mxu1 }
 0x3c0   :  { %v642_v2 = vpop.f32.mrf.mxu1 }
 0x3cc   :  { %v727_v49 = vpop.f32.mrf.mxu0 }
 0x3ce   :  { %v746_v43 = vpop.f32.mrf.mxu2 }
 0x3cf   :  { %v747_v53 = vadd.f32 %v746_v43, %v727_v49  ;;  %v644_v49 = vpop.f32.mrf.mxu1 }
 0x3d1   :  { %v760_v58 = vadd.f32 %v747_v53, %v2063_v28 }
 0x3d2   :  { %v656_v44 = vpop.f32.mrf.mxu3 }
 0x3d3   :  { %v657_v59 = vadd.f32 %v656_v44, %v637_v14  ;;  %v768_v18 = vmax.f32 %v760_v58, 0.0 }
 0x3d4   :  { %v729_v45 = vpop.f32.mrf.mxu0 }
 0x3d5   :  { %v756_v19 = vadd.f32 %v657_v59, %v2063_v28  ;;  %v776_v15 = vadd.f32 %v768_v18, %v2203_v5 }
 0x3d6   :  { %v748_v47 = vpop.f32.mrf.mxu2 }
 0x3d7   :  { %v749_v9 = vadd.f32 %v748_v47, %v729_v45  ;;  %v764_v17 = vmax.f32 %v756_v19, 0.0 }
 0x3d9   :  { %v761_v40 = vadd.f32 %v749_v9, %v2065_v29  ;;  %v772_v14 = vadd.f32 %v764_v17, %v2187_v33 }
 0x3da   :  { %v658_v56 = vpop.f32.mrf.mxu3 }
 0x3db   :  { %v659_v42 = vadd.f32 %v658_v56, %v639_v46  ;;  %v769_v4 = vmax.f32 %v761_v40, 0.0  ;;  %v780_v56 = vsel %vm362_vm4, %v772_v14, 0.0 }
 0x3dc   :  { %v732_v57 = vpop.f32.mrf.mxu0 }
 0x3dd   :  { %v757_v50 = vadd.f32 %v659_v42, %v2065_v29  ;;  %v777_v26 = vadd.f32 %v769_v4, %v2206_v1  ;;  %v793_v1 = vsel %vm362_vm4, %v776_v15, 0.0 }
 0x3de   :  { %v751_v61 = vpop.f32.mrf.mxu2 }
 0x3df   :  { %v752_v63 = vadd.f32 %v751_v61, %v732_v57  ;;  %v765_v27 = vmax.f32 %v757_v50, 0.0  ;;  %v794_v36 = vsel %vm362_vm4, %v777_v26, 0.0 }
 0x3e0   :  { %v795_v46 = vadd.f32 %v794_v36, %v793_v1 }
 0x3e1   :  { %v762_v10 = vadd.f32 %v752_v63, %v2069_v39  ;;  %v773_v37 = vadd.f32 %v765_v27, %v2171_v51 }
 0x3e2   :  { %v661_v21 = vpop.f32.mrf.mxu3 }
 0x3e3   :  { %v770_v22 = vmax.f32 %v762_v10, 0.0  ;;  %v662_v24 = vadd.f32 %v661_v21, %v642_v2  ;;  %v781_v47 = vsel %vm362_vm4, %v773_v37, 0.0 }
 0x3e4   :  { %v734_v32 = vpop.f32.mrf.mxu0  ;;  %v782_v42 = vadd.f32 %v781_v47, %v780_v56 }
 0x3e5   :  { %v758_v30 = vadd.f32 %v662_v24, %v2069_v39  ;;  %v778_v20 = vadd.f32 %v770_v22, %v2146_v0 }
 0x3e6   :  { %v753_v11 = vpop.f32.mrf.mxu2 }
 0x3e7   :  { %v766_v13 = vmax.f32 %v758_v30, 0.0  ;;  %v754_v35 = vadd.f32 %v753_v11, %v734_v32  ;;  %v796_v5 = vsel %vm362_vm4, %v778_v20, 0.0 }
 0x3e8   :  { %v797_v53 = vadd.f32 %v796_v5, %v795_v46 }
 0x3e9   :  { %v763_v38 = vadd.f32 %v754_v35, %v2083_v8  ;;  %v774_v44 = vadd.f32 %v766_v13, %v2168_v16 }
 0x3ea   :  { %v663_v43 = vpop.f32.mrf.mxu3 }
 0x3eb   :  { %v771_v45 = vmax.f32 %v763_v38, 0.0  ;;  %v664_v0 = vadd.f32 %v663_v43, %v644_v49  ;;  %v783_v33 = vsel %vm362_vm4, %v774_v44, 0.0 }
 0x3ec   :  { %v784_v59 = vadd.f32 %v783_v33, %v782_v42 }
 0x3ed   :  { %v779_v9 = vadd.f32 %v771_v45, %v2190_v34  ;;  %v759_v51 = vadd.f32 %v664_v0, %v2083_v8 }
 0x3ef   :  { %v798_v57 = vsel %vm362_vm4, %v779_v9, 0.0  ;;  %v767_v40 = vmax.f32 %v759_v51, 0.0 }
 0x3f0   :  { %v799_v58 = vadd.f32 %v798_v57, %v797_v53 }
 0x3f1   :  { %v775_v16 = vadd.f32 %v767_v40, %v2165_v25 }
 0x3f2   :  { %v800_v61 = vrot.slane %v799_v58, 4 }
 0x3f3   :  { %v785_v63 = vsel %vm362_vm4, %v775_v16, 0.0 }
 0x3f4   :  { %v801_v2 = vadd.f32 %v800_v61, %v799_v58  ;;  %v786_v34 = vadd.f32 %v785_v63, %v784_v59 }
 0x3f6   :  { %v802_v4 = vrot.slane %v801_v2, 2  ;;  %v787_v50 = vrot.slane %v786_v34, 4 }
 0x3f8   :  { %v803_v10 = vadd.f32 %v802_v4, %v801_v2  ;;  %v788_v18 = vadd.f32 %v787_v50, %v786_v34 }
 0x3fa   :  { %v804_v19 = vrot.slane %v803_v10, 1  ;;  %v789_v21 = vrot.slane %v788_v18, 2 }
 0x3fc   :  { %v805_v22 = vadd.f32 %v804_v19, %v803_v10  ;;  %v790_v24 = vadd.f32 %v789_v21, %v788_v18 }
 0x3fe   :  { %v807_v27 = vmul.f32 %v805_v22, %v2100_v41  ;;  %v791_v30 = vrot.slane %v790_v24, 1 }
 0x400   :  { %v2301_v17 = vsub.f32 %v776_v15, %v807_v27  ;;  %v2303_v25 = vsub.f32 %v777_v26, %v807_v27  ;;  %v2305_v32 = vsub.f32 %v778_v20, %v807_v27  ;;  %v2307_v11 = vsub.f32 %v779_v9, %v807_v27 }
 0x401   :  { %v792_v13 = vadd.f32 %v791_v30, %v790_v24 }
 0x402   :  { %v820_v35 = vmul.f32 %v2301_v17, %v2301_v17  ;;  %v821_v36 = vmul.f32 %v2303_v25, %v2303_v25  ;;  %v822_v38 = vmul.f32 %v2305_v32, %v2305_v32  ;;  %v823_v26 = vmul.f32 %v2307_v11, %v2307_v11 }
 0x403   :  { %v806_v1 = vmul.f32 %v792_v13, %v2100_v41 }
 0x404   :  { %v837_v15 = vsel %vm362_vm4, %v820_v35, 0.0  ;;  %v838_v20 = vsel %vm362_vm4, %v821_v36, 0.0  ;;  %v840_v0 = vsel %vm362_vm4, %v822_v38, 0.0  ;;  %v842_v56 = vsel %vm362_vm4, %v823_v26, 0.0 }
 0x405   :  { %v839_v49 = vadd.f32 %v838_v20, %v837_v15  ;;  %v2320_v43 = vsub.f32 %v772_v14, %v806_v1  ;;  %v809_v5 = vsub.f32 %v773_v37, %v806_v1  ;;  %v810_v45 = vsub.f32 %v774_v44, %v806_v1 }
 0x406   :  { %v811_v46 = vsub.f32 %v775_v16, %v806_v1 }
 0x407   :  { %v841_v47 = vadd.f32 %v840_v0, %v839_v49  ;;  %v816_v9 = vmul.f32 %v2320_v43, %v2320_v43  ;;  %v817_v51 = vmul.f32 %v809_v5, %v809_v5  ;;  %v818_v53 = vmul.f32 %v810_v45, %v810_v45 }
 0x408   :  { %v819_v57 = vmul.f32 %v811_v46, %v811_v46 }
 0x409   :  { %v843_v33 = vadd.f32 %v842_v56, %v841_v47  ;;  %v824_v40 = vsel %vm362_vm4, %v816_v9, 0.0  ;;  %v825_v14 = vsel %vm362_vm4, %v817_v51, 0.0  ;;  %v827_v44 = vsel %vm362_vm4, %v818_v53, 0.0 }
 0x40a   :  { %v826_v42 = vadd.f32 %v825_v14, %v824_v40  ;;  %v829_v59 = vsel %vm362_vm4, %v819_v57, 0.0 }
 0x40b   :  { %v844_v37 = vrot.slane %v843_v33, 4 }
 0x40c   :  { %v828_v58 = vadd.f32 %v827_v44, %v826_v42 }
 0x40d   :  { %v845_v16 = vadd.f32 %v844_v37, %v843_v33 }
 0x40e   :  { %v830_v61 = vadd.f32 %v829_v59, %v828_v58 }
 0x40f   :  { %v846_v63 = vrot.slane %v845_v16, 2 }
 0x410   :  { %v831_v2 = vrot.slane %v830_v61, 4 }
 0x411   :  { %v847_v34 = vadd.f32 %v846_v63, %v845_v16 }
 0x412   :  { %v832_v4 = vadd.f32 %v831_v2, %v830_v61 }
 0x413   :  { %v848_v50 = vrot.slane %v847_v34, 1 }
 0x414   :  { %v833_v10 = vrot.slane %v832_v4, 2 }
 0x415   :  { %v849_v18 = vadd.f32 %v848_v50, %v847_v34 }
 0x416   :  { %v834_v19 = vadd.f32 %v833_v10, %v832_v4 }
 0x417   :  { %v851_v21 = vmul.f32 %v849_v18, %v2100_v41 }
 0x418   :  { %v835_v22 = vrot.slane %v834_v19, 1 }
 0x419   :  { %v853_v24 = vadd.f32 1e-05, %v851_v21 }
 0x41a   :  { %v836_v27 = vadd.f32 %v835_v22, %v834_v19 }
 0x41b   :  { %1784 = vrsqrt.f32 %v853_v24  ;;  %vm870_vm13 = vweird.f32 %v853_v24 }
 0x41c   :  { %v850_v30 = vmul.f32 %v836_v27, %v2100_v41 }
 0x41e   :  { %v852_v13 = vadd.f32 1e-05, %v850_v30 }
 0x420   :  { %1786 = vrsqrt.f32 %v852_v13  ;;  %vm860_vm0 = vweird.f32 %v852_v13 }
 0x421   :  { %v1785_v35 = vpop.eup %1784 }
 0x422   :  { %v865_v36 = vmul.f32 %v1785_v35, %v853_v24  ;;  %vm871_vm12 = vweird.f32 %v1785_v35 }
 0x423   :  { %vm872_vm14 = vmor %vm870_vm13, %vm871_vm12 }
 0x424   :  { %v866_v38 = vmul.f32 %v1785_v35, %v865_v36 }
 0x426   :  { %v1787_v1 = vpop.eup %1786  ;;  %v867_v26 = vmul.f32 0.5, %v866_v38 }
 0x427   :  { %v855_v15 = vmul.f32 %v1787_v1, %v852_v13  ;;  %vm861_vm15 = vweird.f32 %v1787_v1 }
 0x428   :  { %v868_v20 = vsub.f32 1.5, %v867_v26  ;;  %vm862_vm1 = vmor %vm860_vm0, %vm861_vm15 }
 0x429   :  { %v856_v49 = vmul.f32 %v1787_v1, %v855_v15 }
 0x42a   :  { %v869_v0 = vmul.f32 %v1785_v35, %v868_v20 }
 0x42b   :  { %v857_v47 = vmul.f32 0.5, %v856_v49 }
 0x42c   :  { %v873_v9 = vsel %vm872_vm14, %v1785_v35, %v869_v0 }
 0x42d   :  { %v858_v51 = vsub.f32 1.5, %v857_v47  ;;  %v880_v53 = vmul.f32 %v873_v9, %v2305_v32  ;;  %v881_v44 = vmul.f32 %v873_v9, %v2307_v11  ;;  %v878_v10 = vmul.f32 %v873_v9, %v2301_v17 }
 0x42e   :  { %v879_v18 = vmul.f32 %v873_v9, %v2303_v25 }
 0x42f   :  { %v859_v56 = vmul.f32 %v1787_v1, %v858_v51  ;;  %v888_v33 = vmul.f32 %v880_v53, %v2140_v48  ;;  %v889_v2 = vmul.f32 %v881_v44, %v2137_v54  ;;  %v886_v22 = vmul.f32 %v878_v10, %v2148_v62 }
 0x430   :  { %v887_v24 = vmul.f32 %v879_v18, %v2156_v23 }
 0x431   :  { %v863_v57 = vsel %vm862_vm1, %v1787_v1, %v859_v56  ;;  %v2335_v40 = vadd.f32 %v888_v33, %v2143_v60  ;;  %v2365_v4 = vadd.f32 %v889_v2, %v2153_v6  ;;  %v2382_v17 = vadd.f32 %v886_v22, %v2183_v7 }
 0x432   :  { %v877_v14 = vmul.f32 %v863_v57, %v811_v46  ;;  %v876_v42 = vmul.f32 %v863_v57, %v810_v45  ;;  %v875_v37 = vmul.f32 %v863_v57, %v809_v5  ;;  %v874_v61 = vmul.f32 %v863_v57, %v2320_v43 }
 0x433   :  { %v904_v58 = vpack.c.bf16 %v2335_v40, %v2335_v40  ;;  %v905_v19 = vpack.c.bf16 %v2365_v4, %v2365_v4  ;;  %v2385_v25 = vadd.f32 %v887_v24, %v2162_v31  ;;  %v902_v27 = vpack.c.bf16 %v2382_v17, %v2382_v17 }
 0x434   :  { %v885_v16 = vmul.f32 %v877_v14, %v2137_v54  ;;  %v884_v32 = vmul.f32 %v876_v42, %v2140_v48  ;;  %v883_v59 = vmul.f32 %v875_v37, %v2156_v23  ;;  %v882_v43 = vmul.f32 %v874_v61, %v2148_v62 }
 0x435   :  { %926 = vrot.lane.b32.xlu1 %v904_v58, %s1797_s24  ;;  %v903_v30 = vpack.c.bf16 %v2385_v25, %v2385_v25 }
 0x436   :  { %v2346_v63 = vadd.f32 %v885_v16, %v2153_v6  ;;  %v2349_v5 = vadd.f32 %v884_v32, %v2143_v60  ;;  %v2352_v11 = vadd.f32 %v883_v59, %v2162_v31  ;;  %v2368_v50 = vadd.f32 %v882_v43, %v2183_v7 }
 0x438   :  { %v901_v45 = vpack.c.bf16 %v2346_v63, %v2346_v63  ;;  %v900_v46 = vpack.c.bf16 %v2349_v5, %v2349_v5  ;;  %v899_v34 = vpack.c.bf16 %v2352_v11, %v2352_v11  ;;  %v898_v21 = vpack.c.bf16 %v2368_v50, %v2368_v50 }
 0x43a   :  { %920 = vrot.lane.b32.xlu0 %v901_v45, %s1797_s24  ;;  %918 = vrot.lane.b32.xlu2 %v900_v46, %s1797_s24 }
 0x43d   :  { %916 = vrot.lane.b32.xlu1 %v899_v34, %s1797_s24 }
 0x442   :  { %928 = vrot.lane.b32.xlu2 %v905_v19, %s1797_s24  ;;  %914 = vrot.lane.b32.xlu0 %v898_v21, %s1797_s24 }
 0x44a   :  { %922 = vrot.lane.b32.xlu2 %v902_v27, %s1797_s24  ;;  %924 = vrot.lane.b32.xlu0 %v903_v30, %s1797_s24 }
 0x494   :  { %v919_v13 = vpop.permute.xlu2 %918 }
 0x495   :  { %940 = vst.msk [vmem:[#allocation2 + $0x8] sm:$0xf] %vm103_vm2, %v919_v13 }
 0x49c   :  { %v929_v35 = vpop.permute.xlu2 %928 }
 0x49d   :  { %945 = vst.msk [vmem:[#allocation2 + $0x1c] sm:$0xf] %vm103_vm2, %v929_v35 }
 0x4a4   :  { %v923_v36 = vpop.permute.xlu2 %922 }
 0x4a5   :  { %942 = vst.msk [vmem:[#allocation2 + $0x10] sm:$0xf] %vm103_vm2, %v923_v36 }
 0x4a7   :  { %v927_v38 = vpop.permute.xlu1 %926 }
 0x4a8   :  { %944 = vst.msk [vmem:[#allocation2 + $0x18] sm:$0xf] %vm103_vm2, %v927_v38 }
 0x4ac   :  { %v921_v1 = vpop.permute.xlu0 %920 }
 0x4ad   :  { %941 = vst.msk [vmem:[#allocation2 + $0xc] sm:$0xf] %vm103_vm2, %v921_v1 }
 0x4af   :  { %v917_v26 = vpop.permute.xlu1 %916  ;;  %v2412_v47 = vld [vmem:[#allocation2 + $0x18] sm:$0xff] }
 0x4b0   :  { %939 = vst.msk [vmem:[#allocation2 + $0x4] sm:$0xf] %vm103_vm2, %v917_v26 }
 0x4b4   :  { %v915_v15 = vpop.permute.xlu0 %914  ;;  %v1759_v20 = vld [vmem:[#allocation2 + $0x8] sm:$0xff] }
 0x4b5   :  { %938 = vst.msk [vmem:[#allocation2] sm:$0xf] %vm103_vm2, %v915_v15  ;;  %976 = vrot.lane.b32.xlu1 %v1759_v20, %s1798_s0  ;;  %994 = vrot.lane.b32.xlu0 %v1759_v20, %s1800_s11 }
 0x4bc   :  { %v925_v49 = vpop.permute.xlu0 %924  ;;  %v1758_v0 = vld [vmem:[#allocation2] sm:$0xff] }
 0x4bd   :  { %943 = vst.msk [vmem:[#allocation2 + $0x14] sm:$0xf] %vm103_vm2, %v925_v49  ;;  %970 = vrot.lane.b32.xlu0 %v1759_v20, %s1799_s10  ;;  %992 = vrot.lane.b32.xlu1 %v1758_v0, %s1800_s11 }
 0x4be   :  { %974 = vrot.lane.b32.xlu2 %v1758_v0, %s1798_s0 }
 0x4c4   :  { %v2414_v9 = vld [vmem:[#allocation2 + $0x10] sm:$0xff] }
 0x4c5   :  { %986 = vrot.lane.b32.xlu0 %v1758_v0, %s1802_s13  ;;  %968 = vrot.lane.b32.xlu1 %v1758_v0, %s1799_s10 }
 0x4c6   :  { %988 = vrot.lane.b32.xlu2 %v1759_v20, %s1802_s13 }
 0x4cd   :  { %962 = vrot.lane.b32.xlu0 %v1758_v0, %s1801_s12  ;;  %982 = vrot.lane.b32.xlu1 %v1759_v20, %s1803_s14 }
 0x4ce   :  { %964 = vrot.lane.b32.xlu2 %v1759_v20, %s1801_s12 }
 0x4d5   :  { %1084 = vrot.lane.b32.xlu1 %v2412_v47, %s1800_s11  ;;  %1064 = vrot.lane.b32.xlu0 %v2414_v9, %s1798_s0 }
 0x4d6   :  { %1066 = vrot.lane.b32.xlu2 %v2412_v47, %s1798_s0 }
 0x4dd   :  { %1060 = vrot.lane.b32.xlu1 %v2412_v47, %s1799_s10  ;;  %1078 = vrot.lane.b32.xlu0 %v2412_v47, %s1802_s13 }
 0x4de   :  { %1082 = vrot.lane.b32.xlu2 %v2414_v9, %s1800_s11 }
 0x4e5   :  { %1076 = vrot.lane.b32.xlu1 %v2414_v9, %s1802_s13  ;;  %1054 = vrot.lane.b32.xlu0 %v2412_v47, %s1801_s12 }
 0x4e6   :  { %1058 = vrot.lane.b32.xlu2 %v2414_v9, %s1799_s10 }
 0x4ed   :  { %1052 = vrot.lane.b32.xlu1 %v2414_v9, %s1801_s12  ;;  %1070 = vrot.lane.b32.xlu0 %v2414_v9, %s1803_s14 }
 0x4ee   :  { %1072 = vrot.lane.b32.xlu2 %v2412_v47, %s1803_s14 }
 0x4f6   :  { %980 = vrot.lane.b32.xlu2 %v1758_v0, %s1803_s14 }
 0x518   :  { %v975_v51 = vpop.permute.xlu2 %974 }
 0x520   :  { %v989_v53 = vpop.permute.xlu2 %988 }
 0x527   :  { %v977_v56 = vpop.permute.xlu1 %976  ;;  %v995_v33 = vpop.permute.xlu0 %994 }
 0x528   :  { %v965_v57 = vpop.permute.xlu2 %964  ;;  %998 = vmatpush.bf16.msra.mxu1 %v977_v56  ;;  %1019 = vmatpush.bf16.msra.mxu3 %v995_v33 }
 0x52c   :  { %999 = vmatpush.bf16.msra.mxu1 %v975_v51 }
 0x52f   :  { %v993_v14 = vpop.permute.xlu1 %992  ;;  %v971_v42 = vpop.permute.xlu0 %970 }
 0x530   :  { %v1067_v37 = vpop.permute.xlu2 %1066  ;;  %1000 = vmatpush.bf16.msra.mxu1 %v971_v42  ;;  %1020 = vmatpush.bf16.msra.mxu3 %v993_v14 }
 0x531   :  { %1088 = vmatpush.bf16.msra.mxu0 %v1067_v37 }
 0x534   :  { %1021 = vmatpush.bf16.msra.mxu3 %v989_v53 }
 0x537   :  { %v969_v44 = vpop.permute.xlu1 %968  ;;  %v987_v58 = vpop.permute.xlu0 %986 }
 0x538   :  { %v1083_v16 = vpop.permute.xlu2 %1082  ;;  %1001 = vmatpush.bf16.msra.mxu1 %v969_v44  ;;  %1022 = vmatpush.bf16.msra.mxu3 %v987_v58 }
 0x53c   :  { %1002 = vmatpush.bf16.msra.mxu1 %v965_v57 }
 0x53f   :  { %v983_v32 = vpop.permute.xlu1 %982  ;;  %v963_v59 = vpop.permute.xlu0 %962 }
 0x540   :  { %v1059_v61 = vpop.permute.xlu2 %1058  ;;  %1003 = vmatpush.bf16.msra.mxu1 %v963_v59  ;;  %1023 = vmatpush.bf16.msra.mxu3 %v983_v32 }
 0x544   :  { %1004 = vmatpush.bf16.msra.mxu1 %v1759_v20 }
 0x547   :  { %v1085_v45 = vpop.permute.xlu1 %1084  ;;  %v1065_v46 = vpop.permute.xlu0 %1064 }
 0x548   :  { %v1073_v2 = vpop.permute.xlu2 %1072  ;;  %1005 = vmatpush.bf16.msra.mxu1 %v1758_v0  ;;  %1089 = vmatpush.bf16.msra.mxu0 %v1065_v46 }
 0x549   :  { %1109 = vmatpush.bf16.msra.mxu2 %v1085_v45 }
 0x54b   :  { %1006 = vmatmul.bf16.vlgmr.msra.gmra.mxu1 %v1997_v55 }
 0x54d   :  { %1110 = vmatpush.bf16.msra.mxu2 %v1083_v16 }
 0x54f   :  { %v1061_v43 = vpop.permute.xlu1 %1060  ;;  %v1079_v34 = vpop.permute.xlu0 %1078 }
 0x550   :  { %v981_v10 = vpop.permute.xlu2 %980  ;;  %1090 = vmatpush.bf16.msra.mxu0 %v1061_v43 }
 0x551   :  { %1024 = vmatpush.bf16.msra.mxu3 %v981_v10  ;;  %1111 = vmatpush.bf16.msra.mxu2 %v1079_v34 }
 0x554   :  { %1714 = vmatmul.msk.bf16.vlgmr.msra.gmra.mxu3 %vm182_vm3, %v1995_v52  ;;  %1091 = vmatpush.bf16.msra.mxu0 %v1059_v61 }
 0x557   :  { %v1077_v18 = vpop.permute.xlu1 %1076  ;;  %v1055_v19 = vpop.permute.xlu0 %1054 }
 0x558   :  { %1092 = vmatpush.bf16.msra.mxu0 %v1055_v19  ;;  %1112 = vmatpush.bf16.msra.mxu2 %v1077_v18 }
 0x55b   :  { %1011 = vmatmul.bf16.gmra.mxu1 %v2037_v12 }
 0x55c   :  { %1113 = vmatpush.bf16.msra.mxu2 %v1073_v2 }
 0x55f   :  { %v1053_v21 = vpop.permute.xlu1 %1052  ;;  %v1071_v22 = vpop.permute.xlu0 %1070 }
 0x560   :  { %1093 = vmatpush.bf16.msra.mxu0 %v1053_v21  ;;  %1114 = vmatpush.bf16.msra.mxu2 %v1071_v22 }
 0x563   :  { %1724 = vmatmul.msk.bf16.vlgmr.msra.gmra.mxu2 %vm182_vm3, %v1995_v52 }
 0x564   :  { %1715 = vmatmul.msk.bf16.gmra.mxu3 %vm182_vm3, %v2025_v3  ;;  %1094 = vmatpush.bf16.msra.mxu0 %v2412_v47 }
 0x568   :  { %1095 = vmatpush.bf16.msra.mxu0 %v2414_v9 }
 0x56b   :  { %1096 = vmatmul.bf16.vlgmr.msra.gmra.mxu0 %v1997_v55 }
 0x573   :  { %1725 = vmatmul.msk.bf16.gmra.mxu2 %vm182_vm3, %v2025_v3 }
 0x57b   :  { %1101 = vmatmul.bf16.gmra.mxu0 %v2037_v12 }
 0x5c8   :  { %v1007_v24 = vpop.f32.mrf.mxu1 }
 0x5d0   :  { %v1009_v30 = vpop.f32.mrf.mxu1 }
 0x5d7   :  { %v1026_v27 = vpop.f32.mrf.mxu3 }
 0x5d8   :  { %v1012_v36 = vpop.f32.mrf.mxu1  ;;  %v1027_v38 = vadd.f32 %v1026_v27, %v1007_v24 }
 0x5da   :  { %v1126_v20 = vadd.f32 %v1027_v38, %v2063_v28 }
 0x5dc   :  { %v1134_v51 = vmax.f32 %v1126_v20, 0.0 }
 0x5de   :  { %v1142_v42 = vadd.f32 %v1134_v51, %v2368_v50 }
 0x5df   :  { %v1028_v13 = vpop.f32.mrf.mxu3 }
 0x5e0   :  { %v1029_v35 = vadd.f32 %v1028_v13, %v1009_v30  ;;  %v1014_v56 = vpop.f32.mrf.mxu1  ;;  %v1150_v59 = vsel %vm362_vm4, %v1142_v42, 0.0 }
 0x5e2   :  { %v1127_v1 = vadd.f32 %v1029_v35, %v2065_v29 }
 0x5e4   :  { %v1135_v47 = vmax.f32 %v1127_v1, 0.0 }
 0x5e6   :  { %v1116_v26 = vpop.f32.mrf.mxu2  ;;  %v1143_v33 = vadd.f32 %v1135_v47, %v2352_v11 }
 0x5e7   :  { %v1031_v15 = vpop.f32.mrf.mxu3 }
 0x5e8   :  { %v1032_v49 = vadd.f32 %v1031_v15, %v1012_v36  ;;  %v1097_v0 = vpop.f32.mrf.mxu0  ;;  %v1151_v16 = vsel %vm362_vm4, %v1143_v33, 0.0 }
 0x5e9   :  { %v1152_v46 = vadd.f32 %v1151_v16, %v1150_v59  ;;  %v1117_v50 = vadd.f32 %v1116_v26, %v1097_v0 }
 0x5ea   :  { %v1128_v9 = vadd.f32 %v1032_v49, %v2069_v39 }
 0x5eb   :  { %v1130_v22 = vadd.f32 %v1117_v50, %v2063_v28 }
 0x5ec   :  { %v1136_v53 = vmax.f32 %v1128_v9, 0.0 }
 0x5ed   :  { %v1138_v35 = vmax.f32 %v1130_v22, 0.0 }
 0x5ee   :  { %v1118_v57 = vpop.f32.mrf.mxu2  ;;  %v1144_v37 = vadd.f32 %v1136_v53, %v2349_v5 }
 0x5ef   :  { %v1033_v14 = vpop.f32.mrf.mxu3  ;;  %v1146_v49 = vadd.f32 %v1138_v35, %v2382_v17 }
 0x5f0   :  { %v1034_v44 = vadd.f32 %v1033_v14, %v1014_v56  ;;  %v1099_v58 = vpop.f32.mrf.mxu0  ;;  %v1153_v61 = vsel %vm362_vm4, %v1144_v37, 0.0 }
 0x5f1   :  { %v1119_v2 = vadd.f32 %v1118_v57, %v1099_v58  ;;  %v1154_v34 = vadd.f32 %v1153_v61, %v1152_v46  ;;  %v1163_v57 = vsel %vm362_vm4, %v1146_v49, 0.0 }
 0x5f2   :  { %v1129_v32 = vadd.f32 %v1034_v44, %v2083_v8 }
 0x5f3   :  { %v1131_v19 = vadd.f32 %v1119_v2, %v2065_v29 }
 0x5f4   :  { %v1137_v45 = vmax.f32 %v1129_v32, 0.0 }
 0x5f5   :  { %v1139_v13 = vmax.f32 %v1131_v19, 0.0 }
 0x5f6   :  { %v1145_v11 = vadd.f32 %v1137_v45, %v2346_v63  ;;  %v1121_v43 = vpop.f32.mrf.mxu2 }
 0x5f7   :  { %v1147_v15 = vadd.f32 %v1139_v13, %v2385_v25 }
 0x5f8   :  { %v1155_v5 = vsel %vm362_vm4, %v1145_v11, 0.0  ;;  %v1102_v10 = vpop.f32.mrf.mxu0 }
 0x5f9   :  { %v1156_v18 = vadd.f32 %v1155_v5, %v1154_v34  ;;  %v1122_v21 = vadd.f32 %v1121_v43, %v1102_v10  ;;  %v1164_v53 = vsel %vm362_vm4, %v1147_v15, 0.0 }
 0x5fa   :  { %v1165_v58 = vadd.f32 %v1164_v53, %v1163_v57 }
 0x5fb   :  { %v1157_v24 = vrot.slane %v1156_v18, 4  ;;  %v1132_v27 = vadd.f32 %v1122_v21, %v2069_v39 }
 0x5fd   :  { %v1158_v30 = vadd.f32 %v1157_v24, %v1156_v18  ;;  %v1140_v63 = vmax.f32 %v1132_v27, 0.0 }
 0x5fe   :  { %v1123_v38 = vpop.f32.mrf.mxu2 }
 0x5ff   :  { %v1159_v36 = vrot.slane %v1158_v30, 2  ;;  %v1148_v47 = vadd.f32 %v1140_v63, %v2335_v40 }
 0x600   :  { %v1104_v1 = vpop.f32.mrf.mxu0 }
 0x601   :  { %v1160_v26 = vadd.f32 %v1159_v36, %v1158_v30  ;;  %v1124_v20 = vadd.f32 %v1123_v38, %v1104_v1  ;;  %v1166_v44 = vsel %vm362_vm4, %v1148_v47, 0.0 }
 0x602   :  { %v1167_v59 = vadd.f32 %v1166_v44, %v1165_v58 }
 0x603   :  { %v1161_v0 = vrot.slane %v1160_v26, 1  ;;  %v1133_v9 = vadd.f32 %v1124_v20, %v2083_v8 }
 0x605   :  { %v1162_v51 = vadd.f32 %v1161_v0, %v1160_v26  ;;  %v1141_v56 = vmax.f32 %v1133_v9, 0.0 }
 0x607   :  { %v1176_v14 = vmul.f32 %v1162_v51, %v2100_v41  ;;  %v1149_v25 = vadd.f32 %v1141_v56, %v2365_v4 }
 0x609   :  { %v2479_v16 = vsub.f32 %v1142_v42, %v1176_v14  ;;  %v2481_v17 = vsub.f32 %v1143_v33, %v1176_v14  ;;  %v2483_v40 = vsub.f32 %v1144_v37, %v1176_v14  ;;  %v2485_v32 = vsub.f32 %v1145_v11, %v1176_v14 }
 0x60a   :  { %v1168_v61 = vsel %vm362_vm4, %v1149_v25, 0.0 }
 0x60b   :  { %v1186_v45 = vmul.f32 %v2479_v16, %v2479_v16  ;;  %v1187_v46 = vmul.f32 %v2481_v17, %v2481_v17  ;;  %v1188_v4 = vmul.f32 %v2483_v40, %v2483_v40  ;;  %v1169_v42 = vadd.f32 %v1168_v61, %v1167_v59 }
 0x60c   :  { %v1189_v33 = vmul.f32 %v2485_v32, %v2485_v32 }
 0x60d   :  { %v1194_v37 = vsel %vm362_vm4, %v1186_v45, 0.0  ;;  %v1195_v2 = vsel %vm362_vm4, %v1187_v46, 0.0  ;;  %v1170_v43 = vrot.slane %v1169_v42, 4  ;;  %v1197_v34 = vsel %vm362_vm4, %v1188_v4, 0.0 }
 0x60e   :  { %v1196_v11 = vadd.f32 %v1195_v2, %v1194_v37  ;;  %v1199_v10 = vsel %vm362_vm4, %v1189_v33, 0.0 }
 0x60f   :  { %v1171_v5 = vadd.f32 %v1170_v43, %v1169_v42 }
 0x610   :  { %v1198_v50 = vadd.f32 %v1197_v34, %v1196_v11 }
 0x611   :  { %v1172_v19 = vrot.slane %v1171_v5, 2 }
 0x612   :  { %v1200_v18 = vadd.f32 %v1199_v10, %v1198_v50 }
 0x613   :  { %v1173_v22 = vadd.f32 %v1172_v19, %v1171_v5 }
 0x614   :  { %v1201_v21 = vrot.slane %v1200_v18, 4 }
 0x615   :  { %v1174_v27 = vrot.slane %v1173_v22, 1 }
 0x616   :  { %v1202_v24 = vadd.f32 %v1201_v21, %v1200_v18 }
 0x617   :  { %v1175_v13 = vadd.f32 %v1174_v27, %v1173_v22 }
 0x618   :  { %v1203_v30 = vrot.slane %v1202_v24, 2 }
 0x619   :  { %v1177_v36 = vmul.f32 %v1175_v13, %v2100_v41 }
 0x61a   :  { %v1204_v35 = vadd.f32 %v1203_v30, %v1202_v24 }
 0x61b   :  { %v2501_v38 = vsub.f32 %v1146_v49, %v1177_v36  ;;  %v2503_v1 = vsub.f32 %v1147_v15, %v1177_v36  ;;  %v1184_v26 = vsub.f32 %v1148_v47, %v1177_v36  ;;  %v1185_v20 = vsub.f32 %v1149_v25, %v1177_v36 }
 0x61c   :  { %v1205_v63 = vrot.slane %v1204_v35, 1 }
 0x61d   :  { %v1190_v9 = vmul.f32 %v2501_v38, %v2501_v38  ;;  %v1191_v51 = vmul.f32 %v2503_v1, %v2503_v1  ;;  %v1192_v53 = vmul.f32 %v1184_v26, %v1184_v26  ;;  %v1193_v57 = vmul.f32 %v1185_v20, %v1185_v20 }
 0x61e   :  { %v1206_v0 = vadd.f32 %v1205_v63, %v1204_v35 }
 0x61f   :  { %v1207_v14 = vsel %vm362_vm4, %v1190_v9, 0.0  ;;  %v1208_v49 = vsel %vm362_vm4, %v1191_v51, 0.0  ;;  %v1210_v47 = vsel %vm362_vm4, %v1192_v53, 0.0  ;;  %v1212_v58 = vsel %vm362_vm4, %v1193_v57, 0.0 }
 0x620   :  { %v1220_v56 = vmul.f32 %v1206_v0, %v2100_v41  ;;  %v1209_v44 = vadd.f32 %v1208_v49, %v1207_v14 }
 0x622   :  { %v1222_v15 = vadd.f32 1e-05, %v1220_v56  ;;  %v1211_v25 = vadd.f32 %v1210_v47, %v1209_v44 }
 0x624   :  { %1788 = vrsqrt.f32 %v1222_v15  ;;  %v1213_v59 = vadd.f32 %v1212_v58, %v1211_v25  ;;  %vm1230_vm6 = vweird.f32 %v1222_v15 }
 0x626   :  { %v1214_v61 = vrot.slane %v1213_v59, 4 }
 0x628   :  { %v1215_v45 = vadd.f32 %v1214_v61, %v1213_v59 }
 0x62a   :  { %v1789_v46 = vpop.eup %1788  ;;  %v1216_v42 = vrot.slane %v1215_v45, 2 }
 0x62b   :  { %v1225_v4 = vmul.f32 %v1789_v46, %v1222_v15  ;;  %vm1231_vm5 = vweird.f32 %v1789_v46 }
 0x62c   :  { %v1217_v37 = vadd.f32 %v1216_v42, %v1215_v45  ;;  %vm1232_vm7 = vmor %vm1230_vm6, %vm1231_vm5 }
 0x62d   :  { %v1226_v33 = vmul.f32 %v1789_v46, %v1225_v4 }
 0x62e   :  { %v1218_v11 = vrot.slane %v1217_v37, 1 }
 0x62f   :  { %v1227_v2 = vmul.f32 0.5, %v1226_v33 }
 0x630   :  { %v1219_v34 = vadd.f32 %v1218_v11, %v1217_v37 }
 0x631   :  { %v1228_v43 = vsub.f32 1.5, %v1227_v2 }
 0x632   :  { %v1221_v5 = vmul.f32 %v1219_v34, %v2100_v41 }
 0x633   :  { %v1229_v50 = vmul.f32 %v1789_v46, %v1228_v43 }
 0x634   :  { %v1223_v18 = vadd.f32 1e-05, %v1221_v5 }
 0x635   :  { %v1233_v10 = vsel %vm1232_vm7, %v1789_v46, %v1229_v50 }
 0x636   :  { %v1247_v19 = vmul.f32 %v1233_v10, %v2485_v32  ;;  %v1246_v21 = vmul.f32 %v1233_v10, %v2483_v40  ;;  %1790 = vrsqrt.f32 %v1223_v18  ;;  %v1244_v27 = vmul.f32 %v1233_v10, %v2479_v16 }
 0x637   :  { %vm1240_vm9 = vweird.f32 %v1223_v18  ;;  %v1245_v15 = vmul.f32 %v1233_v10, %v2481_v17 }
 0x638   :  { %v1255_v22 = vmul.f32 %v1247_v19, %v2137_v54  ;;  %v1254_v24 = vmul.f32 %v1246_v21, %v2140_v48  ;;  %v1252_v40 = vmul.f32 %v1244_v27, %v2148_v62 }
 0x63a   :  { %v2521_v30 = vadd.f32 %v1255_v22, %v2153_v6  ;;  %v2524_v13 = vadd.f32 %v1254_v24, %v2143_v60  ;;  %v2534_v0 = vadd.f32 %v1252_v40, %v2183_v7 }
 0x63c   :  { %v1271_v35 = vpack.c.bf16 %v2521_v30, %v2521_v30  ;;  %v1270_v32 = vpack.c.bf16 %v2524_v13, %v2524_v13  ;;  %v1791_v36 = vpop.eup %1790  ;;  %v1268_v53 = vpack.c.bf16 %v2534_v0, %v2534_v0 }
 0x63d   :  { %v1235_v63 = vmul.f32 %v1791_v36, %v1223_v18  ;;  %vm1241_vm8 = vweird.f32 %v1791_v36 }
 0x63e   :  { %1290 = vrot.lane.b32.xlu2 %v1271_v35, %s1797_s24  ;;  %1288 = vrot.lane.b32.xlu1 %v1270_v32, %s1797_s24  ;;  %vm1242_vm10 = vmor %vm1240_vm9, %vm1241_vm8 }
 0x63f   :  { %v1236_v16 = vmul.f32 %v1791_v36, %v1235_v63 }
 0x641   :  { %v1237_v9 = vmul.f32 0.5, %v1236_v16 }
 0x643   :  { %v1238_v51 = vsub.f32 1.5, %v1237_v9 }
 0x645   :  { %v1239_v56 = vmul.f32 %v1791_v36, %v1238_v51 }
 0x646   :  { %1284 = vrot.lane.b32.xlu2 %v1268_v53, %s1797_s24 }
 0x647   :  { %v1243_v57 = vsel %vm1242_vm10, %v1791_v36, %v1239_v56 }
 0x648   :  { %v1251_v14 = vmul.f32 %v1243_v57, %v1185_v20  ;;  %v1250_v49 = vmul.f32 %v1243_v57, %v1184_v26  ;;  %v1249_v44 = vmul.f32 %v1243_v57, %v2503_v1  ;;  %v1248_v59 = vmul.f32 %v1243_v57, %v2501_v38 }
 0x649   :  { %v1253_v1 = vmul.f32 %v1245_v15, %v2156_v23 }
 0x64a   :  { %v1259_v47 = vmul.f32 %v1251_v14, %v2137_v54  ;;  %v1258_v25 = vmul.f32 %v1250_v49, %v2140_v48  ;;  %v1257_v58 = vmul.f32 %v1249_v44, %v2156_v23  ;;  %v1256_v46 = vmul.f32 %v1248_v59, %v2148_v62 }
 0x64b   :  { %v2566_v4 = vadd.f32 %v1253_v1, %v2162_v31 }
 0x64c   :  { %v2546_v61 = vadd.f32 %v1259_v47, %v2153_v6  ;;  %v2549_v45 = vadd.f32 %v1258_v25, %v2143_v60  ;;  %v2552_v26 = vadd.f32 %v1257_v58, %v2162_v31  ;;  %v2569_v42 = vadd.f32 %v1256_v46, %v2183_v7 }
 0x64d   :  { %v1269_v33 = vpack.c.bf16 %v2566_v4, %v2566_v4 }
 0x64e   :  { %v1275_v17 = vpack.c.bf16 %v2546_v61, %v2546_v61  ;;  %v1274_v20 = vpack.c.bf16 %v2549_v45, %v2549_v45  ;;  %v1273_v38 = vpack.c.bf16 %v2552_v26, %v2552_v26  ;;  %v1272_v37 = vpack.c.bf16 %v2569_v42, %v2569_v42 }
 0x650   :  { %1298 = vrot.lane.b32.xlu1 %v1275_v17, %s1797_s24  ;;  %1296 = vrot.lane.b32.xlu0 %v1274_v20, %s1797_s24 }
 0x651   :  { %1294 = vrot.lane.b32.xlu2 %v1273_v38, %s1797_s24 }
 0x658   :  { %1286 = vrot.lane.b32.xlu0 %v1269_v33, %s1797_s24  ;;  %1292 = vrot.lane.b32.xlu1 %v1272_v37, %s1797_s24 }
 0x698   :  { %v1291_v2 = vpop.permute.xlu2 %1290 }
 0x699   :  { %1311 = vst.msk [vmem:[#allocation2 + $0xc] sm:$0xf] %vm103_vm2, %v1291_v2 }
 0x6a0   :  { %v1285_v11 = vpop.permute.xlu2 %1284 }
 0x6a1   :  { %1308 = vst.msk [vmem:[#allocation2] sm:$0xf] %vm103_vm2, %v1285_v11 }
 0x6ab   :  { %v1295_v43 = vpop.permute.xlu2 %1294 }
 0x6ac   :  { %1313 = vst.msk [vmem:[#allocation2 + $0x14] sm:$0xf] %vm103_vm2, %v1295_v43 }
 0x6b0   :  { %v1289_v34 = vpop.permute.xlu1 %1288 }
 0x6b1   :  { %1310 = vst.msk [vmem:[#allocation2 + $0x8] sm:$0xf] %vm103_vm2, %v1289_v34 }
 0x6b8   :  { %v1763_v50 = vld [vmem:[#allocation2 + $0x8] sm:$0xff] }
 0x6b9   :  { %1346 = vrot.lane.b32.xlu0 %v1763_v50, %s1798_s0  ;;  %1364 = vrot.lane.b32.xlu2 %v1763_v50, %s1800_s11 }
 0x6c1   :  { %1340 = vrot.lane.b32.xlu2 %v1763_v50, %s1799_s10 }
 0x6c2   :  { %v1299_v5 = vpop.permute.xlu1 %1298  ;;  %v1297_v10 = vpop.permute.xlu0 %1296 }
 0x6c3   :  { %1315 = vst.msk [vmem:[#allocation2 + $0x1c] sm:$0xf] %vm103_vm2, %v1299_v5 }
 0x6c4   :  { %1314 = vst.msk [vmem:[#allocation2 + $0x18] sm:$0xf] %vm103_vm2, %v1297_v10 }
 0x6ca   :  { %v1287_v18 = vpop.permute.xlu0 %1286  ;;  %v1293_v19 = vpop.permute.xlu1 %1292 }
 0x6cb   :  { %1309 = vst.msk [vmem:[#allocation2 + $0x4] sm:$0xf] %vm103_vm2, %v1287_v18  ;;  %v1765_v24 = vld [vmem:[#allocation2 + $0x18] sm:$0xff] }
 0x6cc   :  { %1312 = vst.msk [vmem:[#allocation2 + $0x10] sm:$0xf] %vm103_vm2, %v1293_v19 }
 0x6d2   :  { %v1762_v21 = vld [vmem:[#allocation2] sm:$0xff] }
 0x6d3   :  { %1362 = vrot.lane.b32.xlu0 %v1762_v21, %s1800_s11  ;;  %1356 = vrot.lane.b32.xlu2 %v1762_v21, %s1802_s13  ;;  %v2594_v22 = vld [vmem:[#allocation2 + $0x10] sm:$0xff] }
 0x6d4   :  { %1344 = vrot.lane.b32.xlu1 %v1762_v21, %s1798_s0 }
 0x6db   :  { %1338 = vrot.lane.b32.xlu0 %v1762_v21, %s1799_s10  ;;  %1332 = vrot.lane.b32.xlu2 %v1762_v21, %s1801_s12 }
 0x6dc   :  { %1358 = vrot.lane.b32.xlu1 %v1763_v50, %s1802_s13 }
 0x6e3   :  { %1352 = vrot.lane.b32.xlu0 %v1763_v50, %s1803_s14  ;;  %1434 = vrot.lane.b32.xlu2 %v2594_v22, %s1798_s0 }
 0x6e4   :  { %1334 = vrot.lane.b32.xlu1 %v1763_v50, %s1801_s12 }
 0x6eb   :  { %1454 = vrot.lane.b32.xlu0 %v1765_v24, %s1800_s11  ;;  %1448 = vrot.lane.b32.xlu2 %v1765_v24, %s1802_s13 }
 0x6ec   :  { %1436 = vrot.lane.b32.xlu1 %v1765_v24, %s1798_s0 }
 0x6f3   :  { %1430 = vrot.lane.b32.xlu0 %v1765_v24, %s1799_s10  ;;  %1424 = vrot.lane.b32.xlu2 %v1765_v24, %s1801_s12 }
 0x6f4   :  { %1452 = vrot.lane.b32.xlu1 %v2594_v22, %s1800_s11 }
 0x6fb   :  { %1446 = vrot.lane.b32.xlu0 %v2594_v22, %s1802_s13  ;;  %1440 = vrot.lane.b32.xlu2 %v2594_v22, %s1803_s14 }
 0x6fc   :  { %1428 = vrot.lane.b32.xlu1 %v2594_v22, %s1799_s10 }
 0x703   :  { %1422 = vrot.lane.b32.xlu0 %v2594_v22, %s1801_s12 }
 0x704   :  { %1442 = vrot.lane.b32.xlu1 %v1765_v24, %s1803_s14 }
 0x70c   :  { %1350 = vrot.lane.b32.xlu1 %v1762_v21, %s1803_s14 }
 0x713   :  { %v1365_v27 = vpop.permute.xlu2 %1364 }
 0x714   :  { %1389 = vmatpush.bf16.msrb.mxu3 %v1365_v27 }
 0x71b   :  { %v1341_v32 = vpop.permute.xlu2 %1340 }
 0x72b   :  { %v1347_v35 = vpop.permute.xlu0 %1346 }
 0x72c   :  { %1368 = vmatpush.bf16.msrb.mxu1 %v1347_v35 }
 0x72d   :  { %v1357_v63 = vpop.permute.xlu2 %1356 }
 0x735   :  { %v1333_v51 = vpop.permute.xlu2 %1332 }
 0x73d   :  { %v1435_v57 = vpop.permute.xlu2 %1434 }
 0x745   :  { %v1363_v40 = vpop.permute.xlu0 %1362  ;;  %v1449_v15 = vpop.permute.xlu2 %1448 }
 0x746   :  { %v1345_v36 = vpop.permute.xlu1 %1344  ;;  %1390 = vmatpush.bf16.msrb.mxu3 %v1363_v40 }
 0x747   :  { %1369 = vmatpush.bf16.msrb.mxu1 %v1345_v36 }
 0x74b   :  { %1370 = vmatpush.bf16.msrb.mxu1 %v1341_v32 }
 0x74d   :  { %v1339_v16 = vpop.permute.xlu0 %1338  ;;  %v1425_v59 = vpop.permute.xlu2 %1424 }
 0x74e   :  { %v1359_v9 = vpop.permute.xlu1 %1358 }
 0x74f   :  { %1371 = vmatpush.bf16.msrb.mxu1 %v1339_v16  ;;  %1391 = vmatpush.bf16.msrb.mxu3 %v1359_v9 }
 0x753   :  { %1392 = vmatpush.bf16.msrb.mxu3 %v1357_v63 }
 0x755   :  { %v1353_v53 = vpop.permute.xlu0 %1352  ;;  %v1441_v20 = vpop.permute.xlu2 %1440 }
 0x756   :  { %v1335_v56 = vpop.permute.xlu1 %1334 }
 0x757   :  { %1372 = vmatpush.bf16.msrb.mxu1 %v1335_v56  ;;  %1393 = vmatpush.bf16.msrb.mxu3 %v1353_v53 }
 0x75b   :  { %1373 = vmatpush.bf16.msrb.mxu1 %v1333_v51 }
 0x75d   :  { %v1455_v14 = vpop.permute.xlu0 %1454 }
 0x75e   :  { %v1437_v49 = vpop.permute.xlu1 %1436  ;;  %1479 = vmatpush.bf16.msrb.mxu2 %v1455_v14 }
 0x75f   :  { %1374 = vmatpush.bf16.msrb.mxu1 %v1763_v50  ;;  %1458 = vmatpush.bf16.msrb.mxu0 %v1437_v49 }
 0x763   :  { %1375 = vmatpush.bf16.msrb.mxu1 %v1762_v21  ;;  %1459 = vmatpush.bf16.msrb.mxu0 %v1435_v57 }
 0x765   :  { %v1431_v44 = vpop.permute.xlu0 %1430 }
 0x766   :  { %v1453_v47 = vpop.permute.xlu1 %1452  ;;  %1376 = vmatmul.bf16.vlgmr.msrb.gmra.mxu1 %v1997_v55 }
 0x767   :  { %1460 = vmatpush.bf16.msrb.mxu0 %v1431_v44  ;;  %1480 = vmatpush.bf16.msrb.mxu2 %v1453_v47 }
 0x76b   :  { %1481 = vmatpush.bf16.msrb.mxu2 %v1449_v15 }
 0x76d   :  { %v1447_v25 = vpop.permute.xlu0 %1446 }
 0x76e   :  { %v1429_v58 = vpop.permute.xlu1 %1428 }
 0x76f   :  { %1461 = vmatpush.bf16.msrb.mxu0 %v1429_v58  ;;  %1482 = vmatpush.bf16.msrb.mxu2 %v1447_v25 }
 0x773   :  { %1462 = vmatpush.bf16.msrb.mxu0 %v1425_v59 }
 0x775   :  { %v1423_v1 = vpop.permute.xlu0 %1422 }
 0x776   :  { %v1443_v17 = vpop.permute.xlu1 %1442  ;;  %1381 = vmatmul.bf16.gmra.mxu1 %v2037_v12 }
 0x777   :  { %1463 = vmatpush.bf16.msrb.mxu0 %v1423_v1  ;;  %1483 = vmatpush.bf16.msrb.mxu2 %v1443_v17 }
 0x77b   :  { %1464 = vmatpush.bf16.msrb.mxu0 %v1765_v24  ;;  %1484 = vmatpush.bf16.msrb.mxu2 %v1441_v20 }
 0x77e   :  { %1744 = vmatmul.msk.bf16.vlgmr.msrb.gmra.mxu2 %vm182_vm3, %v1995_v52  ;;  %v1351_v38 = vpop.permute.xlu1 %1350 }
 0x77f   :  { %1394 = vmatpush.bf16.msrb.mxu3 %v1351_v38  ;;  %1465 = vmatpush.bf16.msrb.mxu0 %v2594_v22 }
 0x782   :  { %1734 = vmatmul.msk.bf16.vlgmr.msrb.gmra.mxu3 %vm182_vm3, %v1995_v52  ;;  %1466 = vmatmul.bf16.vlgmr.msrb.gmra.mxu0 %v1997_v55 }
 0x78e   :  { %1745 = vmatmul.msk.bf16.gmra.mxu2 %vm182_vm3, %v2025_v3 }
 0x792   :  { %1735 = vmatmul.msk.bf16.gmra.mxu3 %vm182_vm3, %v2025_v3  ;;  %1471 = vmatmul.bf16.gmra.mxu0 %v2037_v12 }
 0x7e3   :  { %v1377_v46 = vpop.f32.mrf.mxu1 }
 0x7eb   :  { %v1379_v43 = vpop.f32.mrf.mxu1 }
 0x7f3   :  { %v1382_v12 = vpop.f32.mrf.mxu1 }
 0x7ff   :  { %v1467_v33 = vpop.f32.mrf.mxu0 }
 0x801   :  { %v1486_v37 = vpop.f32.mrf.mxu2 }
 0x802   :  { %v1487_v5 = vadd.f32 %v1486_v37, %v1467_v33 }
 0x804   :  { %v1500_v19 = vadd.f32 %v1487_v5, %v2063_v28 }
 0x805   :  { %v1396_v2 = vpop.f32.mrf.mxu3 }
 0x806   :  { %v1397_v21 = vadd.f32 %v1396_v2, %v1377_v46  ;;  %v1508_v32 = vmax.f32 %v1500_v19, 0.0 }
 0x807   :  { %v1469_v11 = vpop.f32.mrf.mxu0 }
 0x808   :  { %v1496_v40 = vadd.f32 %v1397_v21, %v2063_v28  ;;  %v1516_v56 = vadd.f32 %v1508_v32, %v2569_v42 }
 0x809   :  { %v1488_v34 = vpop.f32.mrf.mxu2 }
 0x80a   :  { %v1489_v50 = vadd.f32 %v1488_v34, %v1469_v11  ;;  %v1504_v57 = vmax.f32 %v1496_v40, 0.0 }
 0x80c   :  { %v1501_v55 = vadd.f32 %v1489_v50, %v2065_v29  ;;  %v1512_v58 = vadd.f32 %v1504_v57, %v2534_v0 }
 0x80d   :  { %v1398_v52 = vpop.f32.mrf.mxu3 }
 0x80e   :  { %v1399_v18 = vadd.f32 %v1398_v52, %v1379_v43  ;;  %v1509_v24 = vmax.f32 %v1501_v55, 0.0  ;;  %v1520_v37 = vsel %vm362_vm4, %v1512_v58, 0.0 }
 0x80f   :  { %v1472_v10 = vpop.f32.mrf.mxu0 }
 0x810   :  { %v1497_v27 = vadd.f32 %v1399_v18, %v2065_v29  ;;  %v1517_v9 = vadd.f32 %v1509_v24, %v2552_v26  ;;  %v1533_v26 = vsel %vm362_vm4, %v1516_v56, 0.0 }
 0x811   :  { %v1491_v3 = vpop.f32.mrf.mxu2 }
 0x812   :  { %v1492_v22 = vadd.f32 %v1491_v3, %v1472_v10  ;;  %v1505_v51 = vmax.f32 %v1497_v27, 0.0  ;;  %v1534_v47 = vsel %vm362_vm4, %v1517_v9, 0.0 }
 0x813   :  { %v1535_v20 = vadd.f32 %v1534_v47, %v1533_v26 }
 0x814   :  { %v1502_v35 = vadd.f32 %v1492_v22, %v2069_v39  ;;  %v1513_v28 = vadd.f32 %v1505_v51, %v2566_v4 }
 0x815   :  { %v1401_v36 = vpop.f32.mrf.mxu3 }
 0x816   :  { %v1510_v63 = vmax.f32 %v1502_v35, 0.0  ;;  %v1402_v16 = vadd.f32 %v1401_v36, %v1382_v12  ;;  %v1521_v38 = vsel %vm362_vm4, %v1513_v28, 0.0 }
 0x817   :  { %v1474_v14 = vpop.f32.mrf.mxu0  ;;  %v1522_v43 = vadd.f32 %v1521_v38, %v1520_v37 }
 0x818   :  { %v1498_v53 = vadd.f32 %v1402_v16, %v2069_v39  ;;  %v1518_v29 = vadd.f32 %v1510_v63, %v2549_v45  ;;  %v1384_v39 = vpop.f32.mrf.mxu1 }
 0x819   :  { %v1493_v49 = vpop.f32.mrf.mxu2 }
 0x81a   :  { %v1506_v44 = vmax.f32 %v1498_v53, 0.0  ;;  %v1494_v15 = vadd.f32 %v1493_v49, %v1474_v14  ;;  %v1536_v42 = vsel %vm362_vm4, %v1518_v29, 0.0 }
 0x81b   :  { %v1537_v33 = vadd.f32 %v1536_v42, %v1535_v20 }
 0x81c   :  { %v1503_v25 = vadd.f32 %v1494_v15, %v2083_v8  ;;  %v1514_v1 = vadd.f32 %v1506_v44, %v2524_v13 }
 0x81d   :  { %v1403_v59 = vpop.f32.mrf.mxu3 }
 0x81e   :  { %v1511_v17 = vmax.f32 %v1503_v25, 0.0  ;;  %v1404_v45 = vadd.f32 %v1403_v59, %v1384_v39  ;;  %v1523_v0 = vsel %vm362_vm4, %v1514_v1, 0.0 }
 0x81f   :  { %v1524_v50 = vadd.f32 %v1523_v0, %v1522_v43 }
 0x820   :  { %v1519_v46 = vadd.f32 %v1511_v17, %v2546_v61  ;;  %v1499_v4 = vadd.f32 %v1404_v45, %v2083_v8 }
 0x822   :  { %v1538_v2 = vsel %vm362_vm4, %v1519_v46, 0.0  ;;  %v1507_v11 = vmax.f32 %v1499_v4, 0.0 }
 0x823   :  { %v1539_v34 = vadd.f32 %v1538_v2, %v1537_v33 }
 0x824   :  { %v1515_v13 = vadd.f32 %v1507_v11, %v2521_v30 }
 0x825   :  { %v1540_v5 = vrot.slane %v1539_v34, 4 }
 0x826   :  { %v1525_v52 = vsel %vm362_vm4, %v1515_v13, 0.0 }
 0x827   :  { %v1541_v10 = vadd.f32 %v1540_v5, %v1539_v34  ;;  %v1526_v61 = vadd.f32 %v1525_v52, %v1524_v50 }
 0x829   :  { %v1542_v55 = vrot.slane %v1541_v10, 2  ;;  %v1527_v8 = vrot.slane %v1526_v61, 4 }
 0x82b   :  { %v1543_v18 = vadd.f32 %v1542_v55, %v1541_v10  ;;  %v1528_v19 = vadd.f32 %v1527_v8, %v1526_v61 }
 0x82d   :  { %v1544_v21 = vrot.slane %v1543_v18, 1  ;;  %v1529_v3 = vrot.slane %v1528_v19, 2 }
 0x82f   :  { %v1545_v22 = vadd.f32 %v1544_v21, %v1543_v18  ;;  %v1530_v12 = vadd.f32 %v1529_v3, %v1528_v19 }
 0x831   :  { %v1547_v24 = vmul.f32 %v1545_v22, %v2100_v41  ;;  %v1531_v27 = vrot.slane %v1530_v12, 1 }
 0x833   :  { %v2655_v35 = vsub.f32 %v1516_v56, %v1547_v24  ;;  %v2657_v30 = vsub.f32 %v1517_v9, %v1547_v24  ;;  %v2659_v32 = vsub.f32 %v1518_v29, %v1547_v24  ;;  %v2661_v40 = vsub.f32 %v1519_v46, %v1547_v24 }
 0x834   :  { %v1532_v36 = vadd.f32 %v1531_v27, %v1530_v12 }
 0x835   :  { %v1560_v63 = vmul.f32 %v2655_v35, %v2655_v35  ;;  %v1561_v16 = vmul.f32 %v2657_v30, %v2657_v30  ;;  %v1562_v51 = vmul.f32 %v2659_v32, %v2659_v32  ;;  %v1563_v9 = vmul.f32 %v2661_v40, %v2661_v40 }
 0x836   :  { %v1546_v53 = vmul.f32 %v1532_v36, %v2100_v41 }
 0x837   :  { %v1577_v56 = vsel %vm362_vm4, %v1560_v63, 0.0  ;;  %v1578_v57 = vsel %vm362_vm4, %v1561_v16, 0.0  ;;  %v1580_v15 = vsel %vm362_vm4, %v1562_v51, 0.0 }
 0x838   :  { %v1579_v14 = vadd.f32 %v1578_v57, %v1577_v56  ;;  %v2674_v49 = vsub.f32 %v1512_v58, %v1546_v53  ;;  %v2676_v29 = vsub.f32 %v1513_v28, %v1546_v53  ;;  %v2678_v44 = vsub.f32 %v1514_v1, %v1546_v53 }
 0x839   :  { %v2681_v47 = vsub.f32 %v1515_v13, %v1546_v53  ;;  %v1582_v58 = vsel %vm362_vm4, %v1563_v9, 0.0 }
 0x83a   :  { %v1581_v25 = vadd.f32 %v1580_v15, %v1579_v14  ;;  %v1556_v26 = vmul.f32 %v2674_v49, %v2674_v49  ;;  %v1557_v39 = vmul.f32 %v2676_v29, %v2676_v29  ;;  %v1558_v59 = vmul.f32 %v2678_v44, %v2678_v44 }
 0x83b   :  { %v1559_v42 = vmul.f32 %v2681_v47, %v2681_v47 }
 0x83c   :  { %v1583_v28 = vadd.f32 %v1582_v58, %v1581_v25  ;;  %v1564_v1 = vsel %vm362_vm4, %v1556_v26, 0.0  ;;  %v1565_v17 = vsel %vm362_vm4, %v1557_v39, 0.0  ;;  %v1567_v38 = vsel %vm362_vm4, %v1558_v59, 0.0 }
 0x83d   :  { %v1566_v45 = vadd.f32 %v1565_v17, %v1564_v1  ;;  %v1569_v33 = vsel %vm362_vm4, %v1559_v42, 0.0 }
 0x83e   :  { %v1584_v20 = vrot.slane %v1583_v28, 4 }
 0x83f   :  { %v1568_v46 = vadd.f32 %v1567_v38, %v1566_v45 }
 0x840   :  { %v1585_v4 = vadd.f32 %v1584_v20, %v1583_v28 }
 0x841   :  { %v1570_v37 = vadd.f32 %v1569_v33, %v1568_v46 }
 0x842   :  { %v1586_v0 = vrot.slane %v1585_v4, 2 }
 0x843   :  { %v1571_v2 = vrot.slane %v1570_v37, 4 }
 0x844   :  { %v1587_v11 = vadd.f32 %v1586_v0, %v1585_v4 }
 0x845   :  { %v1572_v43 = vadd.f32 %v1571_v2, %v1570_v37 }
 0x846   :  { %v1588_v34 = vrot.slane %v1587_v11, 1 }
 0x847   :  { %v1573_v13 = vrot.slane %v1572_v43, 2 }
 0x848   :  { %v1589_v50 = vadd.f32 %v1588_v34, %v1587_v11 }
 0x849   :  { %v1574_v5 = vadd.f32 %v1573_v13, %v1572_v43 }
 0x84a   :  { %v1591_v52 = vmul.f32 %v1589_v50, %v2100_v41 }
 0x84b   :  { %v1575_v10 = vrot.slane %v1574_v5, 1 }
 0x84c   :  { %v1593_v61 = vadd.f32 1e-05, %v1591_v52 }
 0x84d   :  { %v1576_v55 = vadd.f32 %v1575_v10, %v1574_v5 }
 0x84e   :  { %1792 = vrsqrt.f32 %v1593_v61  ;;  %vm1610_vm3 = vweird.f32 %v1593_v61 }
 0x84f   :  { %v1590_v8 = vmul.f32 %v1576_v55, %v2100_v41 }
 0x851   :  { %v1592_v18 = vadd.f32 1e-05, %v1590_v8 }
 0x853   :  { %1794 = vrsqrt.f32 %v1592_v18  ;;  %vm1600_vm13 = vweird.f32 %v1592_v18 }
 0x854   :  { %v1793_v19 = vpop.eup %1792 }
 0x855   :  { %v1605_v21 = vmul.f32 %v1793_v19, %v1593_v61  ;;  %vm1611_vm2 = vweird.f32 %v1793_v19 }
 0x856   :  { %vm1612_vm11 = vmor %vm1610_vm3, %vm1611_vm2 }
 0x857   :  { %v1606_v3 = vmul.f32 %v1793_v19, %v1605_v21 }
 0x859   :  { %v1795_v22 = vpop.eup %1794  ;;  %v1607_v12 = vmul.f32 0.5, %v1606_v3 }
 0x85a   :  { %v1595_v24 = vmul.f32 %v1795_v22, %v1592_v18  ;;  %vm1601_vm12 = vweird.f32 %v1795_v22 }
 0x85b   :  { %v1608_v27 = vsub.f32 1.5, %v1607_v12  ;;  %vm1602_vm14 = vmor %vm1600_vm13, %vm1601_vm12 }
 0x85c   :  { %v1596_v36 = vmul.f32 %v1795_v22, %v1595_v24 }
 0x85d   :  { %v1609_v63 = vmul.f32 %v1793_v19, %v1608_v27 }
 0x85e   :  { %v1597_v16 = vmul.f32 0.5, %v1596_v36 }
 0x85f   :  { %v1613_v51 = vsel %vm1612_vm11, %v1793_v19, %v1609_v63 }
 0x860   :  { %v1618_v53 = vmul.f32 %v1613_v51, %v2655_v35  ;;  %v1619_v41 = vmul.f32 %v1613_v51, %v2657_v30  ;;  %v1620_v9 = vmul.f32 %v1613_v51, %v2659_v32  ;;  %v1621_v56 = vmul.f32 %v1613_v51, %v2661_v40 }
 0x861   :  { %v1598_v57 = vsub.f32 1.5, %v1597_v16 }
 0x862   :  { %v1626_v14 = vmul.f32 %v1618_v53, %v2148_v62  ;;  %v1627_v15 = vmul.f32 %v1619_v41, %v2156_v23  ;;  %v1628_v25 = vmul.f32 %v1620_v9, %v2140_v48  ;;  %v1629_v26 = vmul.f32 %v1621_v56, %v2137_v54 }
 0x863   :  { %v1599_v39 = vmul.f32 %v1795_v22, %v1598_v57 }
 0x864   :  { %v1634_v35 = vadd.f32 %v1626_v14, %v2183_v7  ;;  %v1635_v30 = vadd.f32 %v1627_v15, %v2162_v31  ;;  %v1636_v32 = vadd.f32 %v1628_v25, %v2143_v60  ;;  %v1637_v40 = vadd.f32 %v1629_v26, %v2153_v6 }
 0x865   :  { %v1603_v59 = vsel %vm1602_vm14, %v1795_v22, %v1599_v39 }
 0x866   :  { %1642 = vst.msk [vmem:[%s2759_s5 + $0x20] sm:$0xff] %vm362_vm4, %v1634_v35  ;;  %v1614_v58 = vmul.f32 %v1603_v59, %v2674_v49  ;;  %v1615_v28 = vmul.f32 %v1603_v59, %v2676_v29  ;;  %v1616_v42 = vmul.f32 %v1603_v59, %v2678_v44  ;;  %v1617_v1 = vmul.f32 %v1603_v59, %v2681_v47 }
 0x867   :  { %1643 = vst.msk [vmem:[%s2759_s5 + $0x28] sm:$0xff] %vm362_vm4, %v1635_v30 }
 0x868   :  { %1644 = vst.msk [vmem:[%s2759_s5 + $0x30] sm:$0xff] %vm362_vm4, %v1636_v32  ;;  %v1622_v17 = vmul.f32 %v1614_v58, %v2148_v62  ;;  %v1623_v49 = vmul.f32 %v1615_v28, %v2156_v23  ;;  %v1624_v29 = vmul.f32 %v1616_v42, %v2140_v48  ;;  %v1625_v44 = vmul.f32 %v1617_v1, %v2137_v54 }
 0x869   :  { %1645 = vst.msk [vmem:[%s2759_s5 + $0x38] sm:$0xff] %vm362_vm4, %v1637_v40 }
 0x86a   :  { %v1630_v47 = vadd.f32 %v1622_v17, %v2183_v7  ;;  %v1631_v45 = vadd.f32 %v1623_v49, %v2162_v31  ;;  %v1632_v20 = vadd.f32 %v1624_v29, %v2143_v60  ;;  %v1633_v38 = vadd.f32 %v1625_v44, %v2153_v6 }
 0x86c   :  { %1638 = vst.msk [vmem:[%s2759_s5] sm:$0xff] %vm362_vm4, %v1630_v47 }
 0x86d   :  { %1639 = vst.msk [vmem:[%s2759_s5 + $0x8] sm:$0xff] %vm362_vm4, %v1631_v45 }
 0x86e   :  { %1640 = vst.msk [vmem:[%s2759_s5 + $0x10] sm:$0xff] %vm362_vm4, %v1632_v20 }
 0x86f   :  { %1641 = vst.msk [vmem:[%s2759_s5 + $0x18] sm:$0xff] %vm362_vm4, %v1633_v38 }

</bundles_post_ra>
